<compile_context>
chip_gen: v6e
topology: v6e:2x2x1
jax: 0.10.0
libtpu: 0.0.40
codegen_flags: <defaults>
</compile_context>

<pallas_src>
import functools

import jax
import jax.numpy as jnp
from jax.experimental import pallas as pl
from jax.experimental.pallas import tpu as pltpu

ACT_DTYPE = jnp.bfloat16      # MXU operand / intermediate activation dtype
LANE = 128                    # minimum lane (minor) tile
MAX_LANE_TILE = 512           # cap so each VMEM block stays small


def _lane_tiling(n):
    """Pad n to a multiple of 128, pick the largest lane tile <= 512 dividing it."""
    n_pad = ((n + LANE - 1) // LANE) * LANE
    tile = LANE
    for cand in range(min(MAX_LANE_TILE, n_pad), LANE - 1, -LANE):
        if n_pad % cand == 0:
            tile = cand
            break
    return n_pad, tile


# ----------------------------------------------------------------------------
# Pallas kernels
# ----------------------------------------------------------------------------
def _gmm_kernel(x_ref, w_ref, b_ref, o_ref, *, alpha):
    """o[g] = act(W[g] @ X[g] + b[g]).  Blocks: W (1,M,K), X (1,K,TN)."""
    acc = jnp.dot(w_ref[0], x_ref[0], preferred_element_type=jnp.float32)
    acc = acc + b_ref[0]
    if alpha is not None:
        acc = jnp.where(acc >= 0.0, acc, alpha * acc)
    o_ref[0] = acc.astype(o_ref.dtype)


def _gmm_res_kernel(x_ref, w_ref, b_ref, r_ref, o_ref, *, alpha):
    """Same as _gmm_kernel but with a fused residual add (res_scale = 1)."""
    acc = jnp.dot(w_ref[0], x_ref[0], preferred_element_type=jnp.float32)
    acc = acc + b_ref[0]
    if alpha is not None:
        acc = jnp.where(acc >= 0.0, acc, alpha * acc)
    acc = acc + r_ref[0].astype(jnp.float32)
    o_ref[0] = acc.astype(o_ref.dtype)


def _conv1x1_chain_kernel(x_ref, w1_ref, b1_ref, w2_ref, b2_ref, o_ref, *, alpha):
    """Two chained 1x1 convs (conv_first -> fusion conv_first), both leaky."""
    h = jnp.dot(w1_ref[...], x_ref[...], preferred_element_type=jnp.float32)
    h = h + b1_ref[...]
    h = jnp.where(h >= 0.0, h, alpha * h)
    y = jnp.dot(w2_ref[...], h.astype(ACT_DTYPE),
                preferred_element_type=jnp.float32)
    y = y + b2_ref[...]
    y = jnp.where(y >= 0.0, y, alpha * y)
    o_ref[...] = y.astype(o_ref.dtype)


def _fusion_attention_kernel(feat_ref, hm_ref, o_ref, *, num_heatmaps, channels):
    """Per-pixel softmax over heatmaps (sublane axis), weighted channel sum.

    feat (K*C, TN), hm (K, TN) -> out (C, TN); all lane-dense.
    """
    hm = hm_ref[...].astype(jnp.float32)                    # (K, TN)
    m = jnp.max(hm, axis=0, keepdims=True)
    e = jnp.exp(hm - m)
    inv = pl.reciprocal(jnp.sum(e, axis=0, keepdims=True), approx=True)
    att = e * inv                                           # (K, TN)
    feat = feat_ref[...].astype(jnp.float32)                # (K*C, TN)
    acc = feat[0:channels, :] * att[0:1, :]
    for k in range(1, num_heatmaps):
        acc = acc + feat[k * channels:(k + 1) * channels, :] * att[k:k + 1, :]
    o_ref[...] = acc.astype(o_ref.dtype)


# ----------------------------------------------------------------------------
# Pallas wrappers
# ----------------------------------------------------------------------------
def grouped_matmul_bias_act(w_g, x_g, b_g, alpha=None, residual=None,
                            out_dtype=ACT_DTYPE):
    """out[g] = act(w_g[g] @ x_g[g] + b_g[g]) (+ residual[g]).

    w_g: (G, M, K)  x_g: (G, K, N)  b_g: (G, M, 1)  residual: (G, M, N)|None.
    The long spatial axis N is the lane (minor) axis -> lane-dense output.
    """
    G, M, K = w_g.shape
    N = x_g.shape[2]
    n_pad, tile_n = _lane_tiling(N)
    n_tiles = n_pad // tile_n
    if n_pad != N:
        x_g = jnp.pad(x_g, ((0, 0), (0, 0), (0, n_pad - N)))
        if residual is not None:
            residual = jnp.pad(residual, ((0, 0), (0, 0), (0, n_pad - N)))

    x_g = x_g.astype(ACT_DTYPE)
    w_g = w_g.astype(ACT_DTYPE)
    b_g = b_g.astype(jnp.float32)

    x_spec = pl.BlockSpec((1, K, tile_n), lambda g, n: (g, 0, n))
    w_spec = pl.BlockSpec((1, M, K), lambda g, n: (g, 0, 0))
    b_spec = pl.BlockSpec((1, M, 1), lambda g, n: (g, 0, 0))
    o_spec = pl.BlockSpec((1, M, tile_n), lambda g, n: (g, 0, n))

    if residual is None:
        kernel = functools.partial(_gmm_kernel, alpha=alpha)
        in_specs = [x_spec, w_spec, b_spec]
        args = (x_g, w_g, b_g)
    else:
        kernel = functools.partial(_gmm_res_kernel, alpha=alpha)
        r_spec = pl.BlockSpec((1, M, tile_n), lambda g, n: (g, 0, n))
        in_specs = [x_spec, w_spec, b_spec, r_spec]
        args = (x_g, w_g, b_g, residual.astype(ACT_DTYPE))

    out = pl.pallas_call(
        kernel,
        grid=(G, n_tiles),
        in_specs=in_specs,
        out_specs=o_spec,
        out_shape=jax.ShapeDtypeStruct((G, M, n_pad), out_dtype),
        compiler_params=pltpu.CompilerParams(
            dimension_semantics=("parallel", "parallel")),
    )(*args)
    return out[:, :, :N]


def conv1x1_chain(x_t, w1, b1, w2, b2, alpha, out_dtype=ACT_DTYPE):
    """y = leaky(W2 @ leaky(W1 @ x + b1) + b2) on channel-major x_t (Cin, N)."""
    C_in, N = x_t.shape
    C_mid = w1.shape[0]
    C_out = w2.shape[0]
    n_pad, tile_n = _lane_tiling(N)
    n_tiles = n_pad // tile_n
    if n_pad != N:
        x_t = jnp.pad(x_t, ((0, 0), (0, n_pad - N)))
    out = pl.pallas_call(
        functools.partial(_conv1x1_chain_kernel, alpha=alpha),
        grid=(n_tiles,),
        in_specs=[
            pl.BlockSpec((C_in, tile_n), lambda n: (0, n)),
            pl.BlockSpec((C_mid, C_in), lambda n: (0, 0)),
            pl.BlockSpec((C_mid, 1), lambda n: (0, 0)),
            pl.BlockSpec((C_out, C_mid), lambda n: (0, 0)),
            pl.BlockSpec((C_out, 1), lambda n: (0, 0)),
        ],
        out_specs=pl.BlockSpec((C_out, tile_n), lambda n: (0, n)),
        out_shape=jax.ShapeDtypeStruct((C_out, n_pad), out_dtype),
        compiler_params=pltpu.CompilerParams(dimension_semantics=("parallel",)),
    )(x_t.astype(ACT_DTYPE),
      w1.astype(ACT_DTYPE), b1.reshape(C_mid, 1).astype(jnp.float32),
      w2.astype(ACT_DTYPE), b2.reshape(C_out, 1).astype(jnp.float32))
    return out[:, :N]


def fusion_attention(feat_t, hm_t, num_heatmaps, channels, out_dtype=ACT_DTYPE):
    """feat_t (K*C, N), hm_t (K, N) -> (C, N)."""
    KC, N = feat_t.shape
    n_pad, tile_n = _lane_tiling(N)
    n_tiles = n_pad // tile_n
    if n_pad != N:
        feat_t = jnp.pad(feat_t, ((0, 0), (0, n_pad - N)))
        hm_t = jnp.pad(hm_t, ((0, 0), (0, n_pad - N)))
    out = pl.pallas_call(
        functools.partial(_fusion_attention_kernel,
                          num_heatmaps=num_heatmaps, channels=channels),
        grid=(n_tiles,),
        in_specs=[
            pl.BlockSpec((KC, tile_n), lambda n: (0, n)),
            pl.BlockSpec((num_heatmaps, tile_n), lambda n: (0, n)),
        ],
        out_specs=pl.BlockSpec((channels, tile_n), lambda n: (0, n)),
        out_shape=jax.ShapeDtypeStruct((channels, n_pad), out_dtype),
        compiler_params=pltpu.CompilerParams(dimension_semantics=("parallel",)),
    )(feat_t, hm_t.astype(jnp.float32))
    return out[:, :N]


# ----------------------------------------------------------------------------
# Conv glue (channel-major im2col / weight packing in plain JAX)
# ----------------------------------------------------------------------------
def _im2col_t(x_t, B, H, W, ksize, stride, pad, groups=1):
    """x_t (C, B*H*W) channel-major -> (groups, k*k*Cg, B*Ho*Wo)."""
    C = x_t.shape[0]
    Cg = C // groups
    x5 = x_t.reshape(groups, Cg, B, H, W)
    xp = jnp.pad(x5, ((0, 0), (0, 0), (0, 0), (pad, pad), (pad, pad)))
    Ho = (H + 2 * pad - ksize) // stride + 1
    Wo = (W + 2 * pad - ksize) // stride + 1
    taps = []
    for kh in range(ksize):
        for kw in range(ksize):
            taps.append(xp[:, :, :, kh:kh + stride * (Ho - 1) + 1:stride,
                           kw:kw + stride * (Wo - 1) + 1:stride])
    col = jnp.stack(taps, axis=1)                      # (G, k*k, Cg, B, Ho, Wo)
    return col.reshape(groups, ksize * ksize * Cg, B * Ho * Wo), Ho, Wo


def conv_weight_to_mat(w, groups=1):
    """PyTorch Conv2d weight (Cout, Cin/g, kH, kW) -> (G, Cout_g, kH*kW*Cin_g)."""
    Cout, Cin_g, kh, kw = w.shape
    Cout_g = Cout // groups
    w5 = w.reshape(groups, Cout_g, Cin_g, kh, kw)
    w5 = jnp.transpose(w5, (0, 1, 3, 4, 2))            # (G, Cout_g, kH, kW, Cin_g)
    return w5.reshape(groups, Cout_g, kh * kw * Cin_g)


def conv2d_t(x_t, spatial, w, b, stride=1, pad=0, alpha=None, groups=1,
             residual=None, out_dtype=ACT_DTYPE):
    """Conv2d on channel-major features.  Returns ((Cout, B*Ho*Wo), spatial')."""
    B, H, W = spatial
    Cout = w.shape[0]
    ksize = w.shape[2]
    if ksize == 1 and stride == 1 and groups == 1:
        cols, Ho, Wo = x_t[None], H, W
    else:
        cols, Ho, Wo = _im2col_t(x_t, B, H, W, ksize, stride, pad, groups)
    w_g = conv_weight_to_mat(w, groups)
    b_g = b.reshape(groups, Cout // groups, 1)
    res_g = None
    if residual is not None:
        res_g = residual.reshape(groups, Cout // groups, -1)
    out = grouped_matmul_bias_act(w_g, cols, b_g, alpha=alpha, residual=res_g,
                                  out_dtype=out_dtype)
    return out.reshape(Cout, B * Ho * Wo), (B, Ho, Wo)


def conv_transpose2d_t(x_t, spatial, w, b, stride, pad, alpha=None,
                       out_dtype=ACT_DTYPE):
    """ConvTranspose2d via stride^2 sub-pixel phase decomposition.

    w: PyTorch ConvTranspose2d layout (Cin, Cout, K, K).  For the DIC config
    (K = stride + 2*pad, pad <= stride) every output phase is a dense 3x3
    conv of the LR input -> one lane-dense matmul, no zero-stuffed FLOPs.
    """
    Cin, Cout, Kk, _ = w.shape
    B, H, W = spatial
    s = stride
    if not (s >= 2 and pad <= s and Kk == s + 2 * pad):
        raise NotImplementedError("phase decomposition assumes K == s + 2*pad, pad <= s")
    phase_rows = []
    for p in range(s):
        for q in range(s):
            taps = []
            for th in range(3):          # input offset e = th - 1 in {-1,0,1}
                for tw in range(3):
                    kh = -s * (th - 1) + p + pad
                    kw = -s * (tw - 1) + q + pad
                    if 0 <= kh < Kk and 0 <= kw < Kk:
                        taps.append(jnp.transpose(w[:, :, kh, kw]))  # (Cout, Cin)
                    else:
                        taps.append(jnp.zeros((Cout, Cin), w.dtype))
            phase_rows.append(jnp.concatenate(taps, axis=1))         # (Cout, 9*Cin)
    w_mat = jnp.concatenate(phase_rows, axis=0)[None]                # (1, s*s*Cout, 9*Cin)
    b_mat = jnp.tile(b, s * s).reshape(1, s * s * Cout, 1)

    cols, _, _ = _im2col_t(x_t, B, H, W, 3, 1, 1, 1)                 # (1, 9*Cin, N)
    out = grouped_matmul_bias_act(w_mat, cols, b_mat, alpha=alpha,
                                  out_dtype=out_dtype)               # (1, s*s*Cout, N)
    # depth-to-space: phases -> HR spatial
    out = out.reshape(s, s, Cout, B, H, W)
    out = jnp.transpose(out, (2, 3, 4, 0, 5, 1))                     # (Cout,B,H,s,W,s)
    out = out.reshape(Cout, B * H * s * W * s)
    return out, (B, H * s, W * s)


# ----------------------------------------------------------------------------
# Parameters (deterministic synthetic init; shapes match the PyTorch module)
# ----------------------------------------------------------------------------
def init_params(key, C, K, num_blocks, num_fusion_blocks, upscale):
    ksz = upscale + 4
    params = {}
    keys = [key]

    def nxt():
        keys[0], sub = jax.random.split(keys[0])
        return sub

    def w_init(shape, scale=0.05):
        return jax.random.normal(nxt(), shape, jnp.float32) * scale

    # FeedbackBlock.conv_first : 1x1 conv (2C -> C) + PReLU(0.2)
    params["conv_first_w"] = w_init((C, 2 * C, 1, 1))
    params["conv_first_b"] = w_init((C,))
    # FeatureHeatmapFusingBlock
    rc = K * C
    params["fusion_first_w"] = w_init((rc, C, 1, 1))
    params["fusion_first_b"] = w_init((rc,))
    for i in range(num_fusion_blocks):
        params[f"fusion_body_{i}_w1"] = w_init((rc, C, 3, 3))   # groups = K
        params[f"fusion_body_{i}_b1"] = w_init((rc,))
        params[f"fusion_body_{i}_w2"] = w_init((rc, C, 3, 3))
        params[f"fusion_body_{i}_b2"] = w_init((rc,))
    # up / down / lr / hr blocks
    for idx in range(num_blocks):
        params[f"up_{idx}_w"] = w_init((C, C, ksz, ksz))   # ConvTranspose2d layout
        params[f"up_{idx}_b"] = w_init((C,))
        params[f"down_{idx}_w"] = w_init((C, C, ksz, ksz))
        params[f"down_{idx}_b"] = w_init((C,))
        if idx > 0:
            params[f"lr_{idx-1}_w"] = w_init((C, C * (idx + 1), 1, 1))
            params[f"lr_{idx-1}_b"] = w_init((C,))
            params[f"hr_{idx-1}_w"] = w_init((C, C * (idx + 1), 1, 1))
            params[f"hr_{idx-1}_b"] = w_init((C,))
    # conv_last : 1x1 conv (num_blocks*C -> C) + PReLU(0.2)
    params["conv_last_w"] = w_init((C, num_blocks * C, 1, 1))
    params["conv_last_b"] = w_init((C,))
    return params


# ----------------------------------------------------------------------------
# Forward pass (matches FeedbackBlockHeatmapAttention.forward)
# ----------------------------------------------------------------------------
def feedback_block_heatmap_attention(params, x, heatmap, *, cfg, last_hidden=None):
    """x, heatmap, last_hidden in NCHW (PyTorch layout).  Returns NCHW output."""
    C = cfg["mid_channels"]
    Khm = cfg["num_heatmaps"]
    num_blocks = cfg["num_blocks"]
    num_fusion = cfg["num_fusion_blocks"]
    stride = cfg["upscale_factor"]
    pad = cfg["padding"]
    alpha = cfg["prelu_init"]   # PReLU scalar at init == LeakyReLU slope 0.2

    B, _, H, W = x.shape

    def to_cm(a):   # NCHW -> channel-major (C, B*H*W)
        return jnp.transpose(a, (1, 0, 2, 3)).reshape(a.shape[1], -1)

    # TODO(synk): nn.Module statefulness (need_reset / last_hidden) is
    # handled functionally via the `last_hidden` argument.
    x_t = to_cm(x)
    hm_t = to_cm(heatmap)
    last_t = x_t if last_hidden is None else to_cm(last_hidden)
    xin = jnp.concatenate([x_t, last_t], axis=0)                 # (2C, N)
    spatial = (B, H, W)

    # conv_first (1x1 2C->C, PReLU) fused with fusion conv_first (1x1 C->K*C, LeakyReLU)
    f = conv1x1_chain(xin,
                      params["conv_first_w"].reshape(C, 2 * C),
                      params["conv_first_b"],
                      params["fusion_first_w"].reshape(Khm * C, C),
                      params["fusion_first_b"], alpha)           # (K*C, N)

    # GroupResBlocks (grouped 3x3 convs, residual add fused into 2nd conv)
    for i in range(num_fusion):
        h1, _ = conv2d_t(f, spatial, params[f"fusion_body_{i}_w1"],
                         params[f"fusion_body_{i}_b1"], 1, 1, alpha, groups=Khm)
        f, _ = conv2d_t(h1, spatial, params[f"fusion_body_{i}_w2"],
                        params[f"fusion_body_{i}_b2"], 1, 1, None, groups=Khm,
                        residual=f)

    fused = fusion_attention(f, hm_t, Khm, C)                    # (C, N)

    # feedback up / down projections
    lr_features = [fused]
    hr_features = []
    lr_spatial = spatial
    for idx in range(num_blocks):
        lr = lr_features[0] if idx == 0 else jnp.concatenate(lr_features, axis=0)
        if idx > 0:
            lr, _ = conv2d_t(lr, lr_spatial, params[f"lr_{idx-1}_w"],
                             params[f"lr_{idx-1}_b"], 1, 0, alpha)
        hr, hr_spatial = conv_transpose2d_t(lr, lr_spatial, params[f"up_{idx}_w"],
                                            params[f"up_{idx}_b"], stride, pad, alpha)
        hr_features.append(hr)
        hr_cat = hr if idx == 0 else jnp.concatenate(hr_features, axis=0)
        if idx > 0:
            hr_cat, _ = conv2d_t(hr_cat, hr_spatial, params[f"hr_{idx-1}_w"],
                                 params[f"hr_{idx-1}_b"], 1, 0, alpha)
        lr_new, _ = conv2d_t(hr_cat, hr_spatial, params[f"down_{idx}_w"],
                             params[f"down_{idx}_b"], stride, pad, alpha)
        lr_features.append(lr_new)

    out_t = jnp.concatenate(lr_features[1:], axis=0)             # (num_blocks*C, N)
    out_t, _ = conv2d_t(out_t, lr_spatial, params["conv_last_w"],
                        params["conv_last_b"], 1, 0, alpha, out_dtype=jnp.float32)
    out = out_t.reshape(C, B, H, W).transpose(1, 0, 2, 3)        # NCHW
    return out  # this is also the new last_hidden


# ----------------------------------------------------------------------------
if __name__ == "__main__":
    cfg = dict(
        mid_channels=8,
        num_blocks=2,
        upscale_factor=2,
        num_heatmaps=4,
        num_fusion_blocks=2,
        padding=2,
        prelu_init=0.2,
    )
    B, H, W = 2, 8, 8

    key = jax.random.PRNGKey(0)
    kp, kx, kh = jax.random.split(key, 3)
    params = init_params(kp, cfg["mid_channels"], cfg["num_heatmaps"],
                         cfg["num_blocks"], cfg["num_fusion_blocks"],
                         cfg["upscale_factor"])
    # NCHW inputs, matching the PyTorch module
    x = jax.random.normal(kx, (B, cfg["mid_channels"], H, W), jnp.float32)
    heatmap = jax.random.normal(kh, (B, cfg["num_heatmaps"], H, W), jnp.float32)

    fwd = jax.jit(functools.partial(feedback_block_heatmap_attention, cfg=cfg))
    out = fwd(params, x, heatmap)
    out = jax.block_until_ready(out)

    assert out.shape == (B, cfg["mid_channels"], H, W), out.shape
    assert bool(jnp.all(jnp.isfinite(out)))
    print("KERNEL_OK")
</pallas_src>

<mosaic_0001>
module attributes {stable_mosaic.version = 11 : i64} {
  func.func @_conv1x1_chain_kernel(%arg0: i32, %arg1: memref<16x128xbf16, #tpu.memory_space<vmem>>, %arg2: memref<8x16xbf16, #tpu.memory_space<vmem>>, %arg3: memref<8x1xf32, #tpu.memory_space<vmem>>, %arg4: memref<32x8xbf16, #tpu.memory_space<vmem>>, %arg5: memref<32x1xf32, #tpu.memory_space<vmem>>, %arg6: memref<32x128xbf16, #tpu.memory_space<vmem>>) attributes {dimension_semantics = [#tpu.dimension_semantics<parallel>], iteration_bounds = array<i64: 1>, scalar_prefetch = 0 : i64, scratch_operands = 0 : i64, tpu.core_type = #tpu.core_type<tc>, window_params = [{transform_indices = @transform_0, window_bounds = array<i64: 16, 128>}, {pipeline_mode = #tpu.pipeline_mode<synchronous>, transform_indices = @transform_1, window_bounds = array<i64: 8, 16>}, {pipeline_mode = #tpu.pipeline_mode<synchronous>, transform_indices = @transform_2, window_bounds = array<i64: 8, 1>}, {pipeline_mode = #tpu.pipeline_mode<synchronous>, transform_indices = @transform_3, window_bounds = array<i64: 32, 8>}, {pipeline_mode = #tpu.pipeline_mode<synchronous>, transform_indices = @transform_4, window_bounds = array<i64: 32, 1>}, {transform_indices = @transform_5, window_bounds = array<i64: 32, 128>}]} {
    %c0 = arith.constant 0 : index
    %c0_0 = arith.constant 0 : index
    %0 = vector.load %arg2[%c0, %c0_0] : memref<8x16xbf16, #tpu.memory_space<vmem>>, vector<8x16xbf16>
    %c0_1 = arith.constant 0 : index
    %c0_2 = arith.constant 0 : index
    %1 = vector.load %arg1[%c0_1, %c0_2] : memref<16x128xbf16, #tpu.memory_space<vmem>>, vector<16x128xbf16>
    %cst = arith.constant dense<0.000000e+00> : vector<8x128xf32>
    %2 = tpu.matmul %0, %1, %cst {dimension_numbers = #tpu.dot_dimension_numbers<[1], [0], [0], [1], [0, 0, 1, 1], [], []>} : vector<8x16xbf16>, vector<16x128xbf16>, vector<8x128xf32> -> vector<8x128xf32>
    %c0_3 = arith.constant 0 : index
    %c0_4 = arith.constant 0 : index
    %3 = vector.load %arg3[%c0_3, %c0_4] : memref<8x1xf32, #tpu.memory_space<vmem>>, vector<8x1xf32>
    %4 = vector.broadcast %3 : vector<8x1xf32> to vector<8x128xf32>
    %5 = arith.addf %2, %4 : vector<8x128xf32>
    %cst_5 = arith.constant 0.000000e+00 : f32
    %6 = vector.broadcast %cst_5 : f32 to vector<8x128xf32>
    %7 = arith.cmpf oge, %5, %6 : vector<8x128xf32>
    %cst_6 = arith.constant 2.000000e-01 : f32
    %8 = vector.broadcast %cst_6 : f32 to vector<8x128xf32>
    %9 = arith.mulf %8, %5 : vector<8x128xf32>
    %10 = arith.select %7, %5, %9 : vector<8x128xi1>, vector<8x128xf32>
    %c0_7 = arith.constant 0 : index
    %c0_8 = arith.constant 0 : index
    %11 = vector.load %arg4[%c0_7, %c0_8] : memref<32x8xbf16, #tpu.memory_space<vmem>>, vector<32x8xbf16>
    %12 = arith.truncf %10 : vector<8x128xf32> to vector<8x128xbf16>
    %cst_9 = arith.constant dense<0.000000e+00> : vector<32x128xf32>
    %13 = tpu.matmul %11, %12, %cst_9 {dimension_numbers = #tpu.dot_dimension_numbers<[1], [0], [0], [1], [0, 0, 1, 1], [], []>} : vector<32x8xbf16>, vector<8x128xbf16>, vector<32x128xf32> -> vector<32x128xf32>
    %c0_10 = arith.constant 0 : index
    %c0_11 = arith.constant 0 : index
    %14 = vector.load %arg5[%c0_10, %c0_11] : memref<32x1xf32, #tpu.memory_space<vmem>>, vector<32x1xf32>
    %15 = vector.broadcast %14 : vector<32x1xf32> to vector<32x128xf32>
    %16 = arith.addf %13, %15 : vector<32x128xf32>
    %cst_12 = arith.constant 0.000000e+00 : f32
    %17 = vector.broadcast %cst_12 : f32 to vector<32x128xf32>
    %18 = arith.cmpf oge, %16, %17 : vector<32x128xf32>
    %cst_13 = arith.constant 2.000000e-01 : f32
    %19 = vector.broadcast %cst_13 : f32 to vector<32x128xf32>
    %20 = arith.mulf %19, %16 : vector<32x128xf32>
    %21 = arith.select %18, %16, %20 : vector<32x128xi1>, vector<32x128xf32>
    %22 = arith.truncf %21 : vector<32x128xf32> to vector<32x128xbf16>
    %c0_14 = arith.constant 0 : index
    %c0_15 = arith.constant 0 : index
    %23 = vector.load %arg6[%c0_14, %c0_15] : memref<32x128xbf16, #tpu.memory_space<vmem>>, vector<32x128xbf16>
    tpu.vector_store %arg6[%c0_14, %c0_15], %22 {strides = array<i32>} : memref<32x128xbf16, #tpu.memory_space<vmem>>, vector<32x128xbf16>,
    return
  }
  func.func @transform_0(%arg0: i32) -> (i32, i32) {
    %c0_i32 = arith.constant 0 : i32
    %c0_i32_0 = arith.constant 0 : i32
    return %c0_i32, %arg0 : i32, i32
  }
  func.func @transform_1(%arg0: i32) -> (i32, i32) {
    %c0_i32 = arith.constant 0 : i32
    %c0_i32_0 = arith.constant 0 : i32
    %c0_i32_1 = arith.constant 0 : i32
    return %c0_i32, %c0_i32_0 : i32, i32
  }
  func.func @transform_2(%arg0: i32) -> (i32, i32) {
    %c0_i32 = arith.constant 0 : i32
    %c0_i32_0 = arith.constant 0 : i32
    %c0_i32_1 = arith.constant 0 : i32
    return %c0_i32, %c0_i32_0 : i32, i32
  }
  func.func @transform_3(%arg0: i32) -> (i32, i32) {
    %c0_i32 = arith.constant 0 : i32
    %c0_i32_0 = arith.constant 0 : i32
    %c0_i32_1 = arith.constant 0 : i32
    return %c0_i32, %c0_i32_0 : i32, i32
  }
  func.func @transform_4(%arg0: i32) -> (i32, i32) {
    %c0_i32 = arith.constant 0 : i32
    %c0_i32_0 = arith.constant 0 : i32
    %c0_i32_1 = arith.constant 0 : i32
    return %c0_i32, %c0_i32_0 : i32, i32
  }
  func.func @transform_5(%arg0: i32) -> (i32, i32) {
    %c0_i32 = arith.constant 0 : i32
    %c0_i32_0 = arith.constant 0 : i32
    return %c0_i32, %arg0 : i32, i32
  }
}

module attributes {stable_mosaic.version = 11 : i64} {
  func.func @_gmm_kernel(%arg0: i32, %arg1: i32, %arg2: memref<1x72x128xbf16, #tpu.memory_space<vmem>>, %arg3: memref<1x8x72xbf16, #tpu.memory_space<vmem>>, %arg4: memref<1x8x1xf32, #tpu.memory_space<vmem>>, %arg5: memref<1x8x128xbf16, #tpu.memory_space<vmem>>) attributes {dimension_semantics = [#tpu.dimension_semantics<parallel>, #tpu.dimension_semantics<parallel>], iteration_bounds = array<i64: 4, 1>, scalar_prefetch = 0 : i64, scratch_operands = 0 : i64, tpu.core_type = #tpu.core_type<tc>, window_params = [{transform_indices = @transform_0, window_bounds = array<i64: 1, 72, 128>}, {transform_indices = @transform_1, window_bounds = array<i64: 1, 8, 72>}, {transform_indices = @transform_2, window_bounds = array<i64: 1, 8, 1>}, {transform_indices = @transform_3, window_bounds = array<i64: 1, 8, 128>}]} {
    %c0 = arith.constant 0 : index
    %c0_0 = arith.constant 0 : index
    %c0_1 = arith.constant 0 : index
    %0 = vector.load %arg3[%c0, %c0_0, %c0_1] : memref<1x8x72xbf16, #tpu.memory_space<vmem>>, vector<1x8x72xbf16>
    %1 = vector.shape_cast %0 : vector<1x8x72xbf16> to vector<8x72xbf16>
    %c0_2 = arith.constant 0 : index
    %c0_3 = arith.constant 0 : index
    %c0_4 = arith.constant 0 : index
    %2 = vector.load %arg2[%c0_2, %c0_3, %c0_4] : memref<1x72x128xbf16, #tpu.memory_space<vmem>>, vector<1x72x128xbf16>
    %3 = vector.shape_cast %2 : vector<1x72x128xbf16> to vector<72x128xbf16>
    %cst = arith.constant dense<0.000000e+00> : vector<8x128xf32>
    %4 = tpu.matmul %1, %3, %cst {dimension_numbers = #tpu.dot_dimension_numbers<[1], [0], [0], [1], [0, 0, 1, 1], [], []>} : vector<8x72xbf16>, vector<72x128xbf16>, vector<8x128xf32> -> vector<8x128xf32>
    %c0_5 = arith.constant 0 : index
    %c0_6 = arith.constant 0 : index
    %c0_7 = arith.constant 0 : index
    %5 = vector.load %arg4[%c0_5, %c0_6, %c0_7] : memref<1x8x1xf32, #tpu.memory_space<vmem>>, vector<1x8x1xf32>
    %6 = vector.shape_cast %5 : vector<1x8x1xf32> to vector<8x1xf32>
    %7 = vector.broadcast %6 : vector<8x1xf32> to vector<8x128xf32>
    %8 = arith.addf %4, %7 : vector<8x128xf32>
    %cst_8 = arith.constant 0.000000e+00 : f32
    %9 = vector.broadcast %cst_8 : f32 to vector<8x128xf32>
    %10 = arith.cmpf oge, %8, %9 : vector<8x128xf32>
    %cst_9 = arith.constant 2.000000e-01 : f32
    %11 = vector.broadcast %cst_9 : f32 to vector<8x128xf32>
    %12 = arith.mulf %11, %8 : vector<8x128xf32>
    %13 = arith.select %10, %8, %12 : vector<8x128xi1>, vector<8x128xf32>
    %14 = arith.truncf %13 : vector<8x128xf32> to vector<8x128xbf16>
    %c0_10 = arith.constant 0 : index
    %c0_11 = arith.constant 0 : index
    %c0_12 = arith.constant 0 : index
    %15 = vector.load %arg5[%c0_10, %c0_11, %c0_12] : memref<1x8x128xbf16, #tpu.memory_space<vmem>>, vector<1x8x128xbf16>
    %16 = vector.shape_cast %15 : vector<1x8x128xbf16> to vector<8x128xbf16>
    %17 = vector.shape_cast %14 : vector<8x128xbf16> to vector<1x8x128xbf16>
    tpu.vector_store %arg5[%c0_10, %c0_11, %c0_12], %17 {strides = array<i32>} : memref<1x8x128xbf16, #tpu.memory_space<vmem>>, vector<1x8x128xbf16>,
    return
  }
  func.func @transform_0(%arg0: i32, %arg1: i32) -> (i32, i32, i32) {
    %c0_i32 = arith.constant 0 : i32
    %c0_i32_0 = arith.constant 0 : i32
    return %arg0, %c0_i32, %arg1 : i32, i32, i32
  }
  func.func @transform_1(%arg0: i32, %arg1: i32) -> (i32, i32, i32) {
    %c0_i32 = arith.constant 0 : i32
    %c0_i32_0 = arith.constant 0 : i32
    %c0_i32_1 = arith.constant 0 : i32
    return %arg0, %c0_i32, %c0_i32_0 : i32, i32, i32
  }
  func.func @transform_2(%arg0: i32, %arg1: i32) -> (i32, i32, i32) {
    %c0_i32 = arith.constant 0 : i32
    %c0_i32_0 = arith.constant 0 : i32
    %c0_i32_1 = arith.constant 0 : i32
    return %arg0, %c0_i32, %c0_i32_0 : i32, i32, i32
  }
  func.func @transform_3(%arg0: i32, %arg1: i32) -> (i32, i32, i32) {
    %c0_i32 = arith.constant 0 : i32
    %c0_i32_0 = arith.constant 0 : i32
    return %arg0, %c0_i32, %arg1 : i32, i32, i32
  }
}

module attributes {stable_mosaic.version = 11 : i64} {
  func.func @_gmm_res_kernel(%arg0: i32, %arg1: i32, %arg2: memref<1x72x128xbf16, #tpu.memory_space<vmem>>, %arg3: memref<1x8x72xbf16, #tpu.memory_space<vmem>>, %arg4: memref<1x8x1xf32, #tpu.memory_space<vmem>>, %arg5: memref<1x8x128xbf16, #tpu.memory_space<vmem>>, %arg6: memref<1x8x128xbf16, #tpu.memory_space<vmem>>) attributes {dimension_semantics = [#tpu.dimension_semantics<parallel>, #tpu.dimension_semantics<parallel>], iteration_bounds = array<i64: 4, 1>, scalar_prefetch = 0 : i64, scratch_operands = 0 : i64, tpu.core_type = #tpu.core_type<tc>, window_params = [{transform_indices = @transform_0, window_bounds = array<i64: 1, 72, 128>}, {transform_indices = @transform_1, window_bounds = array<i64: 1, 8, 72>}, {transform_indices = @transform_2, window_bounds = array<i64: 1, 8, 1>}, {transform_indices = @transform_3, window_bounds = array<i64: 1, 8, 128>}, {transform_indices = @transform_4, window_bounds = array<i64: 1, 8, 128>}]} {
    %c0 = arith.constant 0 : index
    %c0_0 = arith.constant 0 : index
    %c0_1 = arith.constant 0 : index
    %0 = vector.load %arg3[%c0, %c0_0, %c0_1] : memref<1x8x72xbf16, #tpu.memory_space<vmem>>, vector<1x8x72xbf16>
    %1 = vector.shape_cast %0 : vector<1x8x72xbf16> to vector<8x72xbf16>
    %c0_2 = arith.constant 0 : index
    %c0_3 = arith.constant 0 : index
    %c0_4 = arith.constant 0 : index
    %2 = vector.load %arg2[%c0_2, %c0_3, %c0_4] : memref<1x72x128xbf16, #tpu.memory_space<vmem>>, vector<1x72x128xbf16>
    %3 = vector.shape_cast %2 : vector<1x72x128xbf16> to vector<72x128xbf16>
    %cst = arith.constant dense<0.000000e+00> : vector<8x128xf32>
    %4 = tpu.matmul %1, %3, %cst {dimension_numbers = #tpu.dot_dimension_numbers<[1], [0], [0], [1], [0, 0, 1, 1], [], []>} : vector<8x72xbf16>, vector<72x128xbf16>, vector<8x128xf32> -> vector<8x128xf32>
    %c0_5 = arith.constant 0 : index
    %c0_6 = arith.constant 0 : index
    %c0_7 = arith.constant 0 : index
    %5 = vector.load %arg4[%c0_5, %c0_6, %c0_7] : memref<1x8x1xf32, #tpu.memory_space<vmem>>, vector<1x8x1xf32>
    %6 = vector.shape_cast %5 : vector<1x8x1xf32> to vector<8x1xf32>
    %7 = vector.broadcast %6 : vector<8x1xf32> to vector<8x128xf32>
    %8 = arith.addf %4, %7 : vector<8x128xf32>
    %c0_8 = arith.constant 0 : index
    %c0_9 = arith.constant 0 : index
    %c0_10 = arith.constant 0 : index
    %9 = vector.load %arg5[%c0_8, %c0_9, %c0_10] : memref<1x8x128xbf16, #tpu.memory_space<vmem>>, vector<1x8x128xbf16>
    %10 = vector.shape_cast %9 : vector<1x8x128xbf16> to vector<8x128xbf16>
    %11 = arith.extf %10 : vector<8x128xbf16> to vector<8x128xf32>
    %12 = arith.addf %8, %11 : vector<8x128xf32>
    %13 = arith.truncf %12 : vector<8x128xf32> to vector<8x128xbf16>
    %c0_11 = arith.constant 0 : index
    %c0_12 = arith.constant 0 : index
    %c0_13 = arith.constant 0 : index
    %14 = vector.load %arg6[%c0_11, %c0_12, %c0_13] : memref<1x8x128xbf16, #tpu.memory_space<vmem>>, vector<1x8x128xbf16>
    %15 = vector.shape_cast %14 : vector<1x8x128xbf16> to vector<8x128xbf16>
    %16 = vector.shape_cast %13 : vector<8x128xbf16> to vector<1x8x128xbf16>
    tpu.vector_store %arg6[%c0_11, %c0_12, %c0_13], %16 {strides = array<i32>} : memref<1x8x128xbf16, #tpu.memory_space<vmem>>, vector<1x8x128xbf16>,
    return
  }
  func.func @transform_0(%arg0: i32, %arg1: i32) -> (i32, i32, i32) {
    %c0_i32 = arith.constant 0 : i32
    %c0_i32_0 = arith.constant 0 : i32
    return %arg0, %c0_i32, %arg1 : i32, i32, i32
  }
  func.func @transform_1(%arg0: i32, %arg1: i32) -> (i32, i32, i32) {
    %c0_i32 = arith.constant 0 : i32
    %c0_i32_0 = arith.constant 0 : i32
    %c0_i32_1 = arith.constant 0 : i32
    return %arg0, %c0_i32, %c0_i32_0 : i32, i32, i32
  }
  func.func @transform_2(%arg0: i32, %arg1: i32) -> (i32, i32, i32) {
    %c0_i32 = arith.constant 0 : i32
    %c0_i32_0 = arith.constant 0 : i32
    %c0_i32_1 = arith.constant 0 : i32
    return %arg0, %c0_i32, %c0_i32_0 : i32, i32, i32
  }
  func.func @transform_3(%arg0: i32, %arg1: i32) -> (i32, i32, i32) {
    %c0_i32 = arith.constant 0 : i32
    %c0_i32_0 = arith.constant 0 : i32
    return %arg0, %c0_i32, %arg1 : i32, i32, i32
  }
  func.func @transform_4(%arg0: i32, %arg1: i32) -> (i32, i32, i32) {
    %c0_i32 = arith.constant 0 : i32
    %c0_i32_0 = arith.constant 0 : i32
    return %arg0, %c0_i32, %arg1 : i32, i32, i32
  }
}

module attributes {stable_mosaic.version = 11 : i64} {
  func.func @_fusion_attention_kernel(%arg0: i32, %arg1: memref<32x128xbf16, #tpu.memory_space<vmem>>, %arg2: memref<4x128xf32, #tpu.memory_space<vmem>>, %arg3: memref<8x128xbf16, #tpu.memory_space<vmem>>) attributes {dimension_semantics = [#tpu.dimension_semantics<parallel>], iteration_bounds = array<i64: 1>, scalar_prefetch = 0 : i64, scratch_operands = 0 : i64, tpu.core_type = #tpu.core_type<tc>, window_params = [{transform_indices = @transform_0, window_bounds = array<i64: 32, 128>}, {transform_indices = @transform_1, window_bounds = array<i64: 4, 128>}, {transform_indices = @transform_2, window_bounds = array<i64: 8, 128>}]} {
    %c0 = arith.constant 0 : index
    %c0_0 = arith.constant 0 : index
    %0 = vector.load %arg2[%c0, %c0_0] : memref<4x128xf32, #tpu.memory_space<vmem>>, vector<4x128xf32>
    %cst = arith.constant dense<0xFF800000> : vector<128xf32>
    %1 = vector.multi_reduction <maximumf>, %0, %cst [0] : vector<4x128xf32> to vector<128xf32>
    %2 = vector.shape_cast %1 : vector<128xf32> to vector<1x128xf32>
    %3 = vector.broadcast %2 : vector<1x128xf32> to vector<4x128xf32>
    %4 = arith.subf %0, %3 : vector<4x128xf32>
    %5 = math.exp %4 : vector<4x128xf32>
    %cst_1 = arith.constant dense<0.000000e+00> : vector<128xf32>
    %6 = vector.multi_reduction <add>, %5, %cst_1 [0] : vector<4x128xf32> to vector<128xf32>
    %7 = vector.shape_cast %6 : vector<128xf32> to vector<1x128xf32>
    %8 = tpu.reciprocal %7 {approx = true} : vector<1x128xf32> -> vector<1x128xf32>
    %9 = vector.broadcast %8 : vector<1x128xf32> to vector<4x128xf32>
    %10 = arith.mulf %5, %9 : vector<4x128xf32>
    %c0_2 = arith.constant 0 : index
    %c0_3 = arith.constant 0 : index
    %11 = vector.load %arg1[%c0_2, %c0_3] : memref<32x128xbf16, #tpu.memory_space<vmem>>, vector<32x128xbf16>
    %12 = arith.extf %11 : vector<32x128xbf16> to vector<32x128xf32>
    %13 = vector.extract_strided_slice %12 {offsets = [0, 0], sizes = [8, 128], strides = [1, 1]} : vector<32x128xf32> to vector<8x128xf32>
    %14 = vector.extract_strided_slice %10 {offsets = [0, 0], sizes = [1, 128], strides = [1, 1]} : vector<4x128xf32> to vector<1x128xf32>
    %15 = vector.broadcast %14 : vector<1x128xf32> to vector<8x128xf32>
    %16 = arith.mulf %13, %15 : vector<8x128xf32>
    %17 = vector.extract_strided_slice %12 {offsets = [8, 0], sizes = [8, 128], strides = [1, 1]} : vector<32x128xf32> to vector<8x128xf32>
    %18 = vector.extract_strided_slice %10 {offsets = [1, 0], sizes = [1, 128], strides = [1, 1]} : vector<4x128xf32> to vector<1x128xf32>
    %19 = vector.broadcast %18 : vector<1x128xf32> to vector<8x128xf32>
    %20 = arith.mulf %17, %19 : vector<8x128xf32>
    %21 = arith.addf %16, %20 : vector<8x128xf32>
    %22 = vector.extract_strided_slice %12 {offsets = [16, 0], sizes = [8, 128], strides = [1, 1]} : vector<32x128xf32> to vector<8x128xf32>
    %23 = vector.extract_strided_slice %10 {offsets = [2, 0], sizes = [1, 128], strides = [1, 1]} : vector<4x128xf32> to vector<1x128xf32>
    %24 = vector.broadcast %23 : vector<1x128xf32> to vector<8x128xf32>
    %25 = arith.mulf %22, %24 : vector<8x128xf32>
    %26 = arith.addf %21, %25 : vector<8x128xf32>
    %27 = vector.extract_strided_slice %12 {offsets = [24, 0], sizes = [8, 128], strides = [1, 1]} : vector<32x128xf32> to vector<8x128xf32>
    %28 = vector.extract_strided_slice %10 {offsets = [3, 0], sizes = [1, 128], strides = [1, 1]} : vector<4x128xf32> to vector<1x128xf32>
    %29 = vector.broadcast %28 : vector<1x128xf32> to vector<8x128xf32>
    %30 = arith.mulf %27, %29 : vector<8x128xf32>
    %31 = arith.addf %26, %30 : vector<8x128xf32>
    %32 = arith.truncf %31 : vector<8x128xf32> to vector<8x128xbf16>
    %c0_4 = arith.constant 0 : index
    %c0_5 = arith.constant 0 : index
    %33 = vector.load %arg3[%c0_4, %c0_5] : memref<8x128xbf16, #tpu.memory_space<vmem>>, vector<8x128xbf16>
    tpu.vector_store %arg3[%c0_4, %c0_5], %32 {strides = array<i32>} : memref<8x128xbf16, #tpu.memory_space<vmem>>, vector<8x128xbf16>,
    return
  }
  func.func @transform_0(%arg0: i32) -> (i32, i32) {
    %c0_i32 = arith.constant 0 : i32
    %c0_i32_0 = arith.constant 0 : i32
    return %c0_i32, %arg0 : i32, i32
  }
  func.func @transform_1(%arg0: i32) -> (i32, i32) {
    %c0_i32 = arith.constant 0 : i32
    %c0_i32_0 = arith.constant 0 : i32
    return %c0_i32, %arg0 : i32, i32
  }
  func.func @transform_2(%arg0: i32) -> (i32, i32) {
    %c0_i32 = arith.constant 0 : i32
    %c0_i32_0 = arith.constant 0 : i32
    return %c0_i32, %arg0 : i32, i32
  }
}

module attributes {stable_mosaic.version = 11 : i64} {
  func.func @_gmm_kernel(%arg0: i32, %arg1: i32, %arg2: memref<1x72x128xbf16, #tpu.memory_space<vmem>>, %arg3: memref<1x32x72xbf16, #tpu.memory_space<vmem>>, %arg4: memref<1x32x1xf32, #tpu.memory_space<vmem>>, %arg5: memref<1x32x128xbf16, #tpu.memory_space<vmem>>) attributes {dimension_semantics = [#tpu.dimension_semantics<parallel>, #tpu.dimension_semantics<parallel>], iteration_bounds = array<i64: 1, 1>, scalar_prefetch = 0 : i64, scratch_operands = 0 : i64, tpu.core_type = #tpu.core_type<tc>, window_params = [{transform_indices = @transform_0, window_bounds = array<i64: 1, 72, 128>}, {transform_indices = @transform_1, window_bounds = array<i64: 1, 32, 72>}, {transform_indices = @transform_2, window_bounds = array<i64: 1, 32, 1>}, {transform_indices = @transform_3, window_bounds = array<i64: 1, 32, 128>}]} {
    %c0 = arith.constant 0 : index
    %c0_0 = arith.constant 0 : index
    %c0_1 = arith.constant 0 : index
    %0 = vector.load %arg3[%c0, %c0_0, %c0_1] : memref<1x32x72xbf16, #tpu.memory_space<vmem>>, vector<1x32x72xbf16>
    %1 = vector.shape_cast %0 : vector<1x32x72xbf16> to vector<32x72xbf16>
    %c0_2 = arith.constant 0 : index
    %c0_3 = arith.constant 0 : index
    %c0_4 = arith.constant 0 : index
    %2 = vector.load %arg2[%c0_2, %c0_3, %c0_4] : memref<1x72x128xbf16, #tpu.memory_space<vmem>>, vector<1x72x128xbf16>
    %3 = vector.shape_cast %2 : vector<1x72x128xbf16> to vector<72x128xbf16>
    %cst = arith.constant dense<0.000000e+00> : vector<32x128xf32>
    %4 = tpu.matmul %1, %3, %cst {dimension_numbers = #tpu.dot_dimension_numbers<[1], [0], [0], [1], [0, 0, 1, 1], [], []>} : vector<32x72xbf16>, vector<72x128xbf16>, vector<32x128xf32> -> vector<32x128xf32>
    %c0_5 = arith.constant 0 : index
    %c0_6 = arith.constant 0 : index
    %c0_7 = arith.constant 0 : index
    %5 = vector.load %arg4[%c0_5, %c0_6, %c0_7] : memref<1x32x1xf32, #tpu.memory_space<vmem>>, vector<1x32x1xf32>
    %6 = vector.shape_cast %5 : vector<1x32x1xf32> to vector<32x1xf32>
    %7 = vector.broadcast %6 : vector<32x1xf32> to vector<32x128xf32>
    %8 = arith.addf %4, %7 : vector<32x128xf32>
    %cst_8 = arith.constant 0.000000e+00 : f32
    %9 = vector.broadcast %cst_8 : f32 to vector<32x128xf32>
    %10 = arith.cmpf oge, %8, %9 : vector<32x128xf32>
    %cst_9 = arith.constant 2.000000e-01 : f32
    %11 = vector.broadcast %cst_9 : f32 to vector<32x128xf32>
    %12 = arith.mulf %11, %8 : vector<32x128xf32>
    %13 = arith.select %10, %8, %12 : vector<32x128xi1>, vector<32x128xf32>
    %14 = arith.truncf %13 : vector<32x128xf32> to vector<32x128xbf16>
    %c0_10 = arith.constant 0 : index
    %c0_11 = arith.constant 0 : index
    %c0_12 = arith.constant 0 : index
    %15 = vector.load %arg5[%c0_10, %c0_11, %c0_12] : memref<1x32x128xbf16, #tpu.memory_space<vmem>>, vector<1x32x128xbf16>
    %16 = vector.shape_cast %15 : vector<1x32x128xbf16> to vector<32x128xbf16>
    %17 = vector.shape_cast %14 : vector<32x128xbf16> to vector<1x32x128xbf16>
    tpu.vector_store %arg5[%c0_10, %c0_11, %c0_12], %17 {strides = array<i32>} : memref<1x32x128xbf16, #tpu.memory_space<vmem>>, vector<1x32x128xbf16>,
    return
  }
  func.func @transform_0(%arg0: i32, %arg1: i32) -> (i32, i32, i32) {
    %c0_i32 = arith.constant 0 : i32
    %c0_i32_0 = arith.constant 0 : i32
    return %arg0, %c0_i32, %arg1 : i32, i32, i32
  }
  func.func @transform_1(%arg0: i32, %arg1: i32) -> (i32, i32, i32) {
    %c0_i32 = arith.constant 0 : i32
    %c0_i32_0 = arith.constant 0 : i32
    %c0_i32_1 = arith.constant 0 : i32
    return %arg0, %c0_i32, %c0_i32_0 : i32, i32, i32
  }
  func.func @transform_2(%arg0: i32, %arg1: i32) -> (i32, i32, i32) {
    %c0_i32 = arith.constant 0 : i32
    %c0_i32_0 = arith.constant 0 : i32
    %c0_i32_1 = arith.constant 0 : i32
    return %arg0, %c0_i32, %c0_i32_0 : i32, i32, i32
  }
  func.func @transform_3(%arg0: i32, %arg1: i32) -> (i32, i32, i32) {
    %c0_i32 = arith.constant 0 : i32
    %c0_i32_0 = arith.constant 0 : i32
    return %arg0, %c0_i32, %arg1 : i32, i32, i32
  }
}

module attributes {stable_mosaic.version = 11 : i64} {
  func.func @_gmm_kernel(%arg0: i32, %arg1: i32, %arg2: memref<1x288x128xbf16, #tpu.memory_space<vmem>>, %arg3: memref<1x8x288xbf16, #tpu.memory_space<vmem>>, %arg4: memref<1x8x1xf32, #tpu.memory_space<vmem>>, %arg5: memref<1x8x128xbf16, #tpu.memory_space<vmem>>) attributes {dimension_semantics = [#tpu.dimension_semantics<parallel>, #tpu.dimension_semantics<parallel>], iteration_bounds = array<i64: 1, 1>, scalar_prefetch = 0 : i64, scratch_operands = 0 : i64, tpu.core_type = #tpu.core_type<tc>, window_params = [{transform_indices = @transform_0, window_bounds = array<i64: 1, 288, 128>}, {transform_indices = @transform_1, window_bounds = array<i64: 1, 8, 288>}, {transform_indices = @transform_2, window_bounds = array<i64: 1, 8, 1>}, {transform_indices = @transform_3, window_bounds = array<i64: 1, 8, 128>}]} {
    %c0 = arith.constant 0 : index
    %c0_0 = arith.constant 0 : index
    %c0_1 = arith.constant 0 : index
    %0 = vector.load %arg3[%c0, %c0_0, %c0_1] : memref<1x8x288xbf16, #tpu.memory_space<vmem>>, vector<1x8x288xbf16>
    %1 = vector.shape_cast %0 : vector<1x8x288xbf16> to vector<8x288xbf16>
    %c0_2 = arith.constant 0 : index
    %c0_3 = arith.constant 0 : index
    %c0_4 = arith.constant 0 : index
    %2 = vector.load %arg2[%c0_2, %c0_3, %c0_4] : memref<1x288x128xbf16, #tpu.memory_space<vmem>>, vector<1x288x128xbf16>
    %3 = vector.shape_cast %2 : vector<1x288x128xbf16> to vector<288x128xbf16>
    %cst = arith.constant dense<0.000000e+00> : vector<8x128xf32>
    %4 = tpu.matmul %1, %3, %cst {dimension_numbers = #tpu.dot_dimension_numbers<[1], [0], [0], [1], [0, 0, 1, 1], [], []>} : vector<8x288xbf16>, vector<288x128xbf16>, vector<8x128xf32> -> vector<8x128xf32>
    %c0_5 = arith.constant 0 : index
    %c0_6 = arith.constant 0 : index
    %c0_7 = arith.constant 0 : index
    %5 = vector.load %arg4[%c0_5, %c0_6, %c0_7] : memref<1x8x1xf32, #tpu.memory_space<vmem>>, vector<1x8x1xf32>
    %6 = vector.shape_cast %5 : vector<1x8x1xf32> to vector<8x1xf32>
    %7 = vector.broadcast %6 : vector<8x1xf32> to vector<8x128xf32>
    %8 = arith.addf %4, %7 : vector<8x128xf32>
    %cst_8 = arith.constant 0.000000e+00 : f32
    %9 = vector.broadcast %cst_8 : f32 to vector<8x128xf32>
    %10 = arith.cmpf oge, %8, %9 : vector<8x128xf32>
    %cst_9 = arith.constant 2.000000e-01 : f32
    %11 = vector.broadcast %cst_9 : f32 to vector<8x128xf32>
    %12 = arith.mulf %11, %8 : vector<8x128xf32>
    %13 = arith.select %10, %8, %12 : vector<8x128xi1>, vector<8x128xf32>
    %14 = arith.truncf %13 : vector<8x128xf32> to vector<8x128xbf16>
    %c0_10 = arith.constant 0 : index
    %c0_11 = arith.constant 0 : index
    %c0_12 = arith.constant 0 : index
    %15 = vector.load %arg5[%c0_10, %c0_11, %c0_12] : memref<1x8x128xbf16, #tpu.memory_space<vmem>>, vector<1x8x128xbf16>
    %16 = vector.shape_cast %15 : vector<1x8x128xbf16> to vector<8x128xbf16>
    %17 = vector.shape_cast %14 : vector<8x128xbf16> to vector<1x8x128xbf16>
    tpu.vector_store %arg5[%c0_10, %c0_11, %c0_12], %17 {strides = array<i32>} : memref<1x8x128xbf16, #tpu.memory_space<vmem>>, vector<1x8x128xbf16>,
    return
  }
  func.func @transform_0(%arg0: i32, %arg1: i32) -> (i32, i32, i32) {
    %c0_i32 = arith.constant 0 : i32
    %c0_i32_0 = arith.constant 0 : i32
    return %arg0, %c0_i32, %arg1 : i32, i32, i32
  }
  func.func @transform_1(%arg0: i32, %arg1: i32) -> (i32, i32, i32) {
    %c0_i32 = arith.constant 0 : i32
    %c0_i32_0 = arith.constant 0 : i32
    %c0_i32_1 = arith.constant 0 : i32
    return %arg0, %c0_i32, %c0_i32_0 : i32, i32, i32
  }
  func.func @transform_2(%arg0: i32, %arg1: i32) -> (i32, i32, i32) {
    %c0_i32 = arith.constant 0 : i32
    %c0_i32_0 = arith.constant 0 : i32
    %c0_i32_1 = arith.constant 0 : i32
    return %arg0, %c0_i32, %c0_i32_0 : i32, i32, i32
  }
  func.func @transform_3(%arg0: i32, %arg1: i32) -> (i32, i32, i32) {
    %c0_i32 = arith.constant 0 : i32
    %c0_i32_0 = arith.constant 0 : i32
    return %arg0, %c0_i32, %arg1 : i32, i32, i32
  }
}

module attributes {stable_mosaic.version = 11 : i64} {
  func.func @_gmm_kernel(%arg0: i32, %arg1: i32, %arg2: memref<1x16x128xbf16, #tpu.memory_space<vmem>>, %arg3: memref<1x8x16xbf16, #tpu.memory_space<vmem>>, %arg4: memref<1x8x1xf32, #tpu.memory_space<vmem>>, %arg5: memref<1x8x128xbf16, #tpu.memory_space<vmem>>) attributes {dimension_semantics = [#tpu.dimension_semantics<parallel>, #tpu.dimension_semantics<parallel>], iteration_bounds = array<i64: 1, 1>, scalar_prefetch = 0 : i64, scratch_operands = 0 : i64, tpu.core_type = #tpu.core_type<tc>, window_params = [{transform_indices = @transform_0, window_bounds = array<i64: 1, 16, 128>}, {transform_indices = @transform_1, window_bounds = array<i64: 1, 8, 16>}, {transform_indices = @transform_2, window_bounds = array<i64: 1, 8, 1>}, {transform_indices = @transform_3, window_bounds = array<i64: 1, 8, 128>}]} {
    %c0 = arith.constant 0 : index
    %c0_0 = arith.constant 0 : index
    %c0_1 = arith.constant 0 : index
    %0 = vector.load %arg3[%c0, %c0_0, %c0_1] : memref<1x8x16xbf16, #tpu.memory_space<vmem>>, vector<1x8x16xbf16>
    %1 = vector.shape_cast %0 : vector<1x8x16xbf16> to vector<8x16xbf16>
    %c0_2 = arith.constant 0 : index
    %c0_3 = arith.constant 0 : index
    %c0_4 = arith.constant 0 : index
    %2 = vector.load %arg2[%c0_2, %c0_3, %c0_4] : memref<1x16x128xbf16, #tpu.memory_space<vmem>>, vector<1x16x128xbf16>
    %3 = vector.shape_cast %2 : vector<1x16x128xbf16> to vector<16x128xbf16>
    %cst = arith.constant dense<0.000000e+00> : vector<8x128xf32>
    %4 = tpu.matmul %1, %3, %cst {dimension_numbers = #tpu.dot_dimension_numbers<[1], [0], [0], [1], [0, 0, 1, 1], [], []>} : vector<8x16xbf16>, vector<16x128xbf16>, vector<8x128xf32> -> vector<8x128xf32>
    %c0_5 = arith.constant 0 : index
    %c0_6 = arith.constant 0 : index
    %c0_7 = arith.constant 0 : index
    %5 = vector.load %arg4[%c0_5, %c0_6, %c0_7] : memref<1x8x1xf32, #tpu.memory_space<vmem>>, vector<1x8x1xf32>
    %6 = vector.shape_cast %5 : vector<1x8x1xf32> to vector<8x1xf32>
    %7 = vector.broadcast %6 : vector<8x1xf32> to vector<8x128xf32>
    %8 = arith.addf %4, %7 : vector<8x128xf32>
    %cst_8 = arith.constant 0.000000e+00 : f32
    %9 = vector.broadcast %cst_8 : f32 to vector<8x128xf32>
    %10 = arith.cmpf oge, %8, %9 : vector<8x128xf32>
    %cst_9 = arith.constant 2.000000e-01 : f32
    %11 = vector.broadcast %cst_9 : f32 to vector<8x128xf32>
    %12 = arith.mulf %11, %8 : vector<8x128xf32>
    %13 = arith.select %10, %8, %12 : vector<8x128xi1>, vector<8x128xf32>
    %14 = arith.truncf %13 : vector<8x128xf32> to vector<8x128xbf16>
    %c0_10 = arith.constant 0 : index
    %c0_11 = arith.constant 0 : index
    %c0_12 = arith.constant 0 : index
    %15 = vector.load %arg5[%c0_10, %c0_11, %c0_12] : memref<1x8x128xbf16, #tpu.memory_space<vmem>>, vector<1x8x128xbf16>
    %16 = vector.shape_cast %15 : vector<1x8x128xbf16> to vector<8x128xbf16>
    %17 = vector.shape_cast %14 : vector<8x128xbf16> to vector<1x8x128xbf16>
    tpu.vector_store %arg5[%c0_10, %c0_11, %c0_12], %17 {strides = array<i32>} : memref<1x8x128xbf16, #tpu.memory_space<vmem>>, vector<1x8x128xbf16>,
    return
  }
  func.func @transform_0(%arg0: i32, %arg1: i32) -> (i32, i32, i32) {
    %c0_i32 = arith.constant 0 : i32
    %c0_i32_0 = arith.constant 0 : i32
    return %arg0, %c0_i32, %arg1 : i32, i32, i32
  }
  func.func @transform_1(%arg0: i32, %arg1: i32) -> (i32, i32, i32) {
    %c0_i32 = arith.constant 0 : i32
    %c0_i32_0 = arith.constant 0 : i32
    %c0_i32_1 = arith.constant 0 : i32
    return %arg0, %c0_i32, %c0_i32_0 : i32, i32, i32
  }
  func.func @transform_2(%arg0: i32, %arg1: i32) -> (i32, i32, i32) {
    %c0_i32 = arith.constant 0 : i32
    %c0_i32_0 = arith.constant 0 : i32
    %c0_i32_1 = arith.constant 0 : i32
    return %arg0, %c0_i32, %c0_i32_0 : i32, i32, i32
  }
  func.func @transform_3(%arg0: i32, %arg1: i32) -> (i32, i32, i32) {
    %c0_i32 = arith.constant 0 : i32
    %c0_i32_0 = arith.constant 0 : i32
    return %arg0, %c0_i32, %arg1 : i32, i32, i32
  }
}

module attributes {stable_mosaic.version = 11 : i64} {
  func.func @_gmm_kernel(%arg0: i32, %arg1: i32, %arg2: memref<1x16x512xbf16, #tpu.memory_space<vmem>>, %arg3: memref<1x8x16xbf16, #tpu.memory_space<vmem>>, %arg4: memref<1x8x1xf32, #tpu.memory_space<vmem>>, %arg5: memref<1x8x512xbf16, #tpu.memory_space<vmem>>) attributes {dimension_semantics = [#tpu.dimension_semantics<parallel>, #tpu.dimension_semantics<parallel>], iteration_bounds = array<i64: 1, 1>, scalar_prefetch = 0 : i64, scratch_operands = 0 : i64, tpu.core_type = #tpu.core_type<tc>, window_params = [{transform_indices = @transform_0, window_bounds = array<i64: 1, 16, 512>}, {transform_indices = @transform_1, window_bounds = array<i64: 1, 8, 16>}, {transform_indices = @transform_2, window_bounds = array<i64: 1, 8, 1>}, {transform_indices = @transform_3, window_bounds = array<i64: 1, 8, 512>}]} {
    %c0 = arith.constant 0 : index
    %c0_0 = arith.constant 0 : index
    %c0_1 = arith.constant 0 : index
    %0 = vector.load %arg3[%c0, %c0_0, %c0_1] : memref<1x8x16xbf16, #tpu.memory_space<vmem>>, vector<1x8x16xbf16>
    %1 = vector.shape_cast %0 : vector<1x8x16xbf16> to vector<8x16xbf16>
    %c0_2 = arith.constant 0 : index
    %c0_3 = arith.constant 0 : index
    %c0_4 = arith.constant 0 : index
    %2 = vector.load %arg2[%c0_2, %c0_3, %c0_4] : memref<1x16x512xbf16, #tpu.memory_space<vmem>>, vector<1x16x512xbf16>
    %3 = vector.shape_cast %2 : vector<1x16x512xbf16> to vector<16x512xbf16>
    %cst = arith.constant dense<0.000000e+00> : vector<8x512xf32>
    %4 = tpu.matmul %1, %3, %cst {dimension_numbers = #tpu.dot_dimension_numbers<[1], [0], [0], [1], [0, 0, 1, 1], [], []>} : vector<8x16xbf16>, vector<16x512xbf16>, vector<8x512xf32> -> vector<8x512xf32>
    %c0_5 = arith.constant 0 : index
    %c0_6 = arith.constant 0 : index
    %c0_7 = arith.constant 0 : index
    %5 = vector.load %arg4[%c0_5, %c0_6, %c0_7] : memref<1x8x1xf32, #tpu.memory_space<vmem>>, vector<1x8x1xf32>
    %6 = vector.shape_cast %5 : vector<1x8x1xf32> to vector<8x1xf32>
    %7 = vector.broadcast %6 : vector<8x1xf32> to vector<8x512xf32>
    %8 = arith.addf %4, %7 : vector<8x512xf32>
    %cst_8 = arith.constant 0.000000e+00 : f32
    %9 = vector.broadcast %cst_8 : f32 to vector<8x512xf32>
    %10 = arith.cmpf oge, %8, %9 : vector<8x512xf32>
    %cst_9 = arith.constant 2.000000e-01 : f32
    %11 = vector.broadcast %cst_9 : f32 to vector<8x512xf32>
    %12 = arith.mulf %11, %8 : vector<8x512xf32>
    %13 = arith.select %10, %8, %12 : vector<8x512xi1>, vector<8x512xf32>
    %14 = arith.truncf %13 : vector<8x512xf32> to vector<8x512xbf16>
    %c0_10 = arith.constant 0 : index
    %c0_11 = arith.constant 0 : index
    %c0_12 = arith.constant 0 : index
    %15 = vector.load %arg5[%c0_10, %c0_11, %c0_12] : memref<1x8x512xbf16, #tpu.memory_space<vmem>>, vector<1x8x512xbf16>
    %16 = vector.shape_cast %15 : vector<1x8x512xbf16> to vector<8x512xbf16>
    %17 = vector.shape_cast %14 : vector<8x512xbf16> to vector<1x8x512xbf16>
    tpu.vector_store %arg5[%c0_10, %c0_11, %c0_12], %17 {strides = array<i32>} : memref<1x8x512xbf16, #tpu.memory_space<vmem>>, vector<1x8x512xbf16>,
    return
  }
  func.func @transform_0(%arg0: i32, %arg1: i32) -> (i32, i32, i32) {
    %c0_i32 = arith.constant 0 : i32
    %c0_i32_0 = arith.constant 0 : i32
    return %arg0, %c0_i32, %arg1 : i32, i32, i32
  }
  func.func @transform_1(%arg0: i32, %arg1: i32) -> (i32, i32, i32) {
    %c0_i32 = arith.constant 0 : i32
    %c0_i32_0 = arith.constant 0 : i32
    %c0_i32_1 = arith.constant 0 : i32
    return %arg0, %c0_i32, %c0_i32_0 : i32, i32, i32
  }
  func.func @transform_2(%arg0: i32, %arg1: i32) -> (i32, i32, i32) {
    %c0_i32 = arith.constant 0 : i32
    %c0_i32_0 = arith.constant 0 : i32
    %c0_i32_1 = arith.constant 0 : i32
    return %arg0, %c0_i32, %c0_i32_0 : i32, i32, i32
  }
  func.func @transform_3(%arg0: i32, %arg1: i32) -> (i32, i32, i32) {
    %c0_i32 = arith.constant 0 : i32
    %c0_i32_0 = arith.constant 0 : i32
    return %arg0, %c0_i32, %arg1 : i32, i32, i32
  }
}

module attributes {stable_mosaic.version = 11 : i64} {
  func.func @_gmm_kernel(%arg0: i32, %arg1: i32, %arg2: memref<1x16x128xbf16, #tpu.memory_space<vmem>>, %arg3: memref<1x8x16xbf16, #tpu.memory_space<vmem>>, %arg4: memref<1x8x1xf32, #tpu.memory_space<vmem>>, %arg5: memref<1x8x128xf32, #tpu.memory_space<vmem>>) attributes {dimension_semantics = [#tpu.dimension_semantics<parallel>, #tpu.dimension_semantics<parallel>], iteration_bounds = array<i64: 1, 1>, scalar_prefetch = 0 : i64, scratch_operands = 0 : i64, tpu.core_type = #tpu.core_type<tc>, window_params = [{transform_indices = @transform_0, window_bounds = array<i64: 1, 16, 128>}, {transform_indices = @transform_1, window_bounds = array<i64: 1, 8, 16>}, {transform_indices = @transform_2, window_bounds = array<i64: 1, 8, 1>}, {transform_indices = @transform_3, window_bounds = array<i64: 1, 8, 128>}]} {
    %c0 = arith.constant 0 : index
    %c0_0 = arith.constant 0 : index
    %c0_1 = arith.constant 0 : index
    %0 = vector.load %arg3[%c0, %c0_0, %c0_1] : memref<1x8x16xbf16, #tpu.memory_space<vmem>>, vector<1x8x16xbf16>
    %1 = vector.shape_cast %0 : vector<1x8x16xbf16> to vector<8x16xbf16>
    %c0_2 = arith.constant 0 : index
    %c0_3 = arith.constant 0 : index
    %c0_4 = arith.constant 0 : index
    %2 = vector.load %arg2[%c0_2, %c0_3, %c0_4] : memref<1x16x128xbf16, #tpu.memory_space<vmem>>, vector<1x16x128xbf16>
    %3 = vector.shape_cast %2 : vector<1x16x128xbf16> to vector<16x128xbf16>
    %cst = arith.constant dense<0.000000e+00> : vector<8x128xf32>
    %4 = tpu.matmul %1, %3, %cst {dimension_numbers = #tpu.dot_dimension_numbers<[1], [0], [0], [1], [0, 0, 1, 1], [], []>} : vector<8x16xbf16>, vector<16x128xbf16>, vector<8x128xf32> -> vector<8x128xf32>
    %c0_5 = arith.constant 0 : index
    %c0_6 = arith.constant 0 : index
    %c0_7 = arith.constant 0 : index
    %5 = vector.load %arg4[%c0_5, %c0_6, %c0_7] : memref<1x8x1xf32, #tpu.memory_space<vmem>>, vector<1x8x1xf32>
    %6 = vector.shape_cast %5 : vector<1x8x1xf32> to vector<8x1xf32>
    %7 = vector.broadcast %6 : vector<8x1xf32> to vector<8x128xf32>
    %8 = arith.addf %4, %7 : vector<8x128xf32>
    %cst_8 = arith.constant 0.000000e+00 : f32
    %9 = vector.broadcast %cst_8 : f32 to vector<8x128xf32>
    %10 = arith.cmpf oge, %8, %9 : vector<8x128xf32>
    %cst_9 = arith.constant 2.000000e-01 : f32
    %11 = vector.broadcast %cst_9 : f32 to vector<8x128xf32>
    %12 = arith.mulf %11, %8 : vector<8x128xf32>
    %13 = arith.select %10, %8, %12 : vector<8x128xi1>, vector<8x128xf32>
    %c0_10 = arith.constant 0 : index
    %c0_11 = arith.constant 0 : index
    %c0_12 = arith.constant 0 : index
    %14 = vector.load %arg5[%c0_10, %c0_11, %c0_12] : memref<1x8x128xf32, #tpu.memory_space<vmem>>, vector<1x8x128xf32>
    %15 = vector.shape_cast %14 : vector<1x8x128xf32> to vector<8x128xf32>
    %16 = vector.shape_cast %13 : vector<8x128xf32> to vector<1x8x128xf32>
    tpu.vector_store %arg5[%c0_10, %c0_11, %c0_12], %16 {strides = array<i32>} : memref<1x8x128xf32, #tpu.memory_space<vmem>>, vector<1x8x128xf32>,
    return
  }
  func.func @transform_0(%arg0: i32, %arg1: i32) -> (i32, i32, i32) {
    %c0_i32 = arith.constant 0 : i32
    %c0_i32_0 = arith.constant 0 : i32
    return %arg0, %c0_i32, %arg1 : i32, i32, i32
  }
  func.func @transform_1(%arg0: i32, %arg1: i32) -> (i32, i32, i32) {
    %c0_i32 = arith.constant 0 : i32
    %c0_i32_0 = arith.constant 0 : i32
    %c0_i32_1 = arith.constant 0 : i32
    return %arg0, %c0_i32, %c0_i32_0 : i32, i32, i32
  }
  func.func @transform_2(%arg0: i32, %arg1: i32) -> (i32, i32, i32) {
    %c0_i32 = arith.constant 0 : i32
    %c0_i32_0 = arith.constant 0 : i32
    %c0_i32_1 = arith.constant 0 : i32
    return %arg0, %c0_i32, %c0_i32_0 : i32, i32, i32
  }
  func.func @transform_3(%arg0: i32, %arg1: i32) -> (i32, i32, i32) {
    %c0_i32 = arith.constant 0 : i32
    %c0_i32_0 = arith.constant 0 : i32
    return %arg0, %c0_i32, %arg1 : i32, i32, i32
  }
}

</mosaic_0001>

<bundles_post_ra>
// kernel: feedback_block_heatmap_attention.13
= control target key start
LH: loop header
LB: loop body
LE: loop exit
PB: predicated region body
PF: predicated region fallthrough
CT: control target
= control target key end

     0   :  { %v269_v0 = vmov 0.0   ;;  %vm270_vm0 = vmmov 0   ;;  %v271_v2 = vmov 0   ;;  %vm36_vm1 = vcmask 130048   ;;  %s337_s0 = inlined_call_operand.vmem [shape: bf16[16,128], index: 0, kind: input, shape index: {}]   ;;  %s338_s1 = inlined_call_operand.vmem [shape: bf16[8,16], index: 1, kind: input, shape index: {}]   ;;  %s339_s2 = inlined_call_operand.vmem [shape: f32[8,1], index: 2, kind: input, shape index: {}]   ;;  %s340_s4 = inlined_call_operand.vmem [shape: f32[32,1], index: 4, kind: input, shape index: {}]   ;;  %s341_s3 = inlined_call_operand.vmem [shape: bf16[32,8], index: 3, kind: input, shape index: {}]   ;;  %s342_s5 = inlined_call_operand.vmem [shape: bf16[32,128], index: 5, kind: output, shape index: {}]  }
   0x1   :  { %248 = vmatprep.subr.bf16.mxu0 %v269_v0  ;;  %v266_v1 = vld [vmem:[%s337_s0] sm:$0xff]   ;;  %250 = vmatprep.mubr.msk.bf16.mxu0 %vm270_vm0, %v269_v0  ;;  %v91_v6 = vld [vmem:[%s340_s4 + $0x18] sm:$0xff]  ;;  %vm122_vm2 = vcmask 64512   ;;  %v89_v8 = vld [vmem:[%s340_s4 + $0x8] sm:$0xff]  ;;  %vm129_vm4 = vcmask 1043456  }
   0x2   :  { %264 = vset.pattern.permute.xlu0 %v271_v2  ;;  %v24_v3 = vld [vmem:[%s339_s2] sm:$0xff]  ;;  %265 = vset.pattern.permute.xlu1 %v271_v2  ;;  %v90_v9 = vld [vmem:[%s340_s4 + $0x10] sm:$0xff]  ;;  %v268_v20 = vld [vmem:[%s341_s3 + $0x8] sm:$0xff]  }
   0x3   :  { %249 = vmatpush3.bf16.msra.mxu0 %v266_v1  ;;  %v21_v4 = vld [vmem:[%s338_s1] sm:$0xf]  ;;  %27 = vperm.xlu0 %264, %v24_v3  }
   0x4   :  { %v88_v5 = vld [vmem:[%s340_s4] sm:$0xff]  ;;  %99 = vperm.xlu1 %265, %v89_v8  }
   0x5   :  { %v267_v7 = vld [vmem:[%s341_s3] sm:$0xff]  }
   0x6   :  { %251 = vmatmul.mubr.msk.bf16.vlgmr.msra.gmra.mxu0 %vm36_vm1, %v21_v4  ;;  %256 = vmatprep.mubr.msk.bf16.mxu1 %vm122_vm2, %v267_v7 }
   0x7   :  { %94 = vperm.xlu0 %264, %v88_v5  }
   0x8   :  { %104 = vperm.xlu1 %265, %v90_v9  }
   0xb   :  { %109 = vperm.xlu0 %264, %v91_v6  }
  0x7e   :  { %v28_v10 = vpop.permute.xlu0 %27 }
  0x7f   :  { %v100_v21 = vpop.permute.xlu1 %99 }
  0x82   :  { %v95_v22 = vpop.permute.xlu0 %94 }
  0x83   :  { %v105_v23 = vpop.permute.xlu1 %104 }
  0x86   :  { %v110_v28 = vpop.permute.xlu0 %109 }
  0xc6   :  { %v74_v11 = vpop.f32.mrf.mxu0 }
  0xc7   :  { %v75_v12 = vadd.f32 %v74_v11, %v28_v10 }
  0xc8   :  { %v252_v13 = vpop.f32.mrf.mxu0 }
  0xc9   :  { %v81_v14 = vmul.f32 0.2, %v75_v12  ;;  %vm80_vm3 = vcmp.ge.f32.partialorder %v75_v12, 0.0 }
  0xca   :  { %v77_v15 = vpop.f32.mrf.mxu0 }
  0xcb   :  { %v82_v16 = vsel %vm80_vm3, %v75_v12, %v81_v14 }
  0xcc   :  { %v253_v17 = vpop.f32.mrf.mxu0  ;;  %v87_v18 = vpack.c.bf16 %v82_v16, %v82_v16 }
  0xce   :  { %260 = vmatprep.subr.msk.bf16.mxu1 %vm129_vm4, %v87_v18  ;;  %v131_v19 = vsel %vm129_vm4, %v87_v18, 0 }
  0xcf   :  { %255 = vmatpush3.bf16.msra.mxu1 %v131_v19 }
  0xd2   :  { %257 = vmatmul.mubr.msk.bf16.vlgmr.msra.gmra.mxu1 %vm122_vm2, %v268_v20 }
 0x192   :  { %v258_v24 = vpop.f32.mrf.mxu1 }
 0x193   :  { %v176_v25 = vadd.f32 %v258_v24, %v105_v23 }
 0x194   :  { %v167_v26 = vpop.f32.mrf.mxu1 }
 0x195   :  { %v168_v27 = vadd.f32 %v167_v26, %v95_v22  ;;  %v188_v30 = vmul.f32 0.2, %v176_v25  ;;  %vm184_vm5 = vcmp.ge.f32.partialorder %v176_v25, 0.0 }
 0x196   :  { %v259_v29 = vpop.f32.mrf.mxu1 }
 0x197   :  { %v179_v31 = vadd.f32 %v259_v29, %v110_v28  ;;  %v186_v33 = vmul.f32 0.2, %v168_v27  ;;  %vm182_vm7 = vcmp.ge.f32.partialorder %v168_v27, 0.0  ;;  %v192_v36 = vsel %vm184_vm5, %v176_v25, %v188_v30 }
 0x198   :  { %v170_v32 = vpop.f32.mrf.mxu1 }
 0x199   :  { %vm185_vm6 = vcmp.ge.f32.partialorder %v179_v31, 0.0  ;;  %v189_v34 = vmul.f32 0.2, %v179_v31  ;;  %v171_v35 = vadd.f32 %v170_v32, %v100_v21  ;;  %v190_v40 = vsel %vm182_vm7, %v168_v27, %v186_v33 }
 0x19b   :  { %v193_v37 = vsel %vm185_vm6, %v179_v31, %v189_v34  ;;  %vm183_vm8 = vcmp.ge.f32.partialorder %v171_v35, 0.0  ;;  %v187_v38 = vmul.f32 0.2, %v171_v35 }
 0x19c   :  { %v240_v39 = vpack.c.bf16 %v193_v37, %v192_v36 }
 0x19d   :  { %v191_v41 = vsel %vm183_vm8, %v171_v35, %v187_v38 }
 0x19e   :  { %242 = vst [vmem:[%s342_s5 + $0x8] sm:$0xff] %v240_v39   ;;  %v235_v42 = vpack.c.bf16 %v191_v41, %v190_v40 }
 0x1a0   :  { %236 = vst [vmem:[%s342_s5] sm:$0xff] %v235_v42  }

// kernel: feedback_block_heatmap_attention.14
= control target key start
LH: loop header
LB: loop body
LE: loop exit
PB: predicated region body
PF: predicated region fallthrough
CT: control target
= control target key end

     0   :  { %s550_s12 = smov 0   ;;  %s552_s13 = smov 0   ;;  %s594_s0 = inlined_call_operand.vmem [shape: bf16[4,72,128], index: 0, kind: input, shape index: {}]   ;;  %s595_s1 = inlined_call_operand.vmem [shape: bf16[4,8,72], index: 1, kind: input, shape index: {}]   ;;  %s596_s2 = inlined_call_operand.vmem [shape: f32[4,8,1], index: 2, kind: input, shape index: {}]   ;;  %s597_s3 = inlined_call_operand.vmem [shape: bf16[4,8,128], index: 3, kind: output, shape index: {}]  }
   0x1   :  { %s554_s14 = smov 0  }
   0x2 LB: > { %s25_s15 = sadd.s32 1, %s521_s13  ;;  %p436_p0 = scmp.ge.s32.totalorder %s525_s14, 1  ;;  %s525_s14 = sphi %s554_s14, %s13_s14   ;;  %s521_s13 = sphi %s552_s13, %s599_s13   ;;  %s517_s12 = sphi %s550_s12, %s598_s12  }
   0x3   : > { %p27_p1 = scmp.ge.s32.totalorder %s25_s15, 4  ;;  %p174_p2 = scmp.lt.s32.totalorder %s525_s14, 5 }
   0x5   : > { %s601_s15 = smov (%p27_p1, %s25_s15), 0  ;;  %p175_p3 = pnand %p436_p0, %p174_p2 }
   0x6   : > { %p211_p4 = scmp.lt.s32.totalorder (!%p175_p3), %s517_s12, 3 }
   0x7   : > { %178 = sbr.rel (%p175_p3) target bundleno = 238 (0xee), region = 32 }
   0xc   : > { %v527_v0 = vmov 0.0   ;;  %vm528_vm0 = vmmov 0   ;;  %s603_s12 = smov (!%p211_p4, %s517_s12), 3  ;;  %v529_v1 = vmov 0   ;;  %vm282_vm1 = vcmask 1043456  }
   0xd   : > { %455 = vmatprep.subr.bf16.mxu0 %v527_v0  ;;  %465 = vmatprep.mubr.msk.bf16.mxu0 %vm528_vm0, %v527_v0  ;;  %s469_s16 = smul.u32 36, %s603_s12  ;;  %s439_s20 = sshll.u32 %s603_s12, 3  ;;  %vm278_vm2 = vcmask 588800  }
   0xe   : > { %497 = vset.pattern.permute.xlu0 %v529_v1  ;;  %s226_s23 = scalar_lea.vmem %s596_s2, %s439_s20  ;;  %s438_s24 = sshll.u32 %s603_s12, 2 }
   0xf   : > { %s218_s19 = scalar_lea.vmem %s594_s0, %s469_s16  ;;  %v245_v5 = vld [vmem:[%s226_s23] sm:$0xff]  ;;  %s222_s27 = scalar_lea.vmem %s595_s1, %s438_s24 }
  0x10   : > { %v498_v2 = vld [vmem:[%s218_s19 + $0x20] ss:$0 sps:$4 sm:$0xff]   ;;  %v499_v4 = vld [vmem:[%s218_s19 + $0x18] sm:$0xff]   ;;  %248 = vperm.xlu0 %497, %v245_v5   ;;  %v500_v6 = vld [vmem:[%s218_s19 + $0x10] sm:$0xff]   ;;  %s233_s30 = scalar_lea.vmem %s597_s3, %s438_s24 }
  0x11   : > { %v284_v3 = vsel %vm282_vm1, %v498_v2, 0  ;;  %v501_v7 = vld [vmem:[%s218_s19 + $0x8] sm:$0xff]   ;;  %v502_v8 = vld [vmem:[%s218_s19] sm:$0xff]  }
  0x12   : > { %456 = vmatpush3.bf16.msra.mxu0 %v284_v3  ;;  %v235_v9 = vld [vmem:[%s222_s27] sm:$0xf] }
  0x13   : > { %457 = vmatprep.subr.bf16.mxu0 %v527_v0 }
  0x16   : > { %458 = vmatpush3.bf16.msra.mxu0 %v499_v4 }
  0x17   : > { %459 = vmatprep.subr.bf16.mxu0 %v527_v0 }
  0x1a   : > { %460 = vmatpush3.bf16.msra.mxu0 %v500_v6 }
  0x1b   : > { %461 = vmatprep.subr.bf16.mxu0 %v527_v0 }
  0x1e   : > { %462 = vmatpush3.bf16.msra.mxu0 %v501_v7 }
  0x1f   : > { %463 = vmatprep.subr.bf16.mxu0 %v527_v0 }
  0x22   : > { %464 = vmatpush3.bf16.msra.mxu0 %v502_v8 }
  0x25   : > { %466 = vmatmul.mubr.msk.bf16.vlgmr.msra.gmra.mxu0 %vm278_vm2, %v235_v9 }
  0x8b   : > { %v249_v10 = vpop.permute.xlu0 %248 }
  0xe5   : > { %v320_v11 = vpop.f32.mrf.mxu0 }
  0xe6   : > { %v321_v12 = vadd.f32 %v320_v11, %v249_v10 }
  0xe7   : > { %v467_v13 = vpop.f32.mrf.mxu0 }
  0xe8   : > { %vm326_vm3 = vcmp.ge.f32.partialorder %v321_v12, 0.0  ;;  %v327_v14 = vmul.f32 0.2, %v321_v12 }
  0xe9   : > { %v323_v15 = vpop.f32.mrf.mxu0 }
  0xea   : > { %v328_v16 = vsel %vm326_vm3, %v321_v12, %v327_v14 }
  0xeb   : > { %v329_v17 = vpack.c.bf16 %v328_v16, %v328_v16  ;;  %v468_v18 = vpop.f32.mrf.mxu0 }
  0xed   : > { %330 = vst [vmem:[%s233_s30] sm:$0xf] %v329_v17 }
  0xee PF: > { %s13_s14 = sadd.s32 1, %s525_s14   ;;  %s598_s12 = smov %s521_s13 }
  0xef   : > { %p10_p5 = scmp.ge.s32.totalorder %s13_s14, 6   ;;  %s599_s13 = smov %s601_s15 }
  0xf1   :  { %12 = sbr.rel (!%p10_p5) target bundleno = 2 (0x2), region = 68 }

// kernel: feedback_block_heatmap_attention.15
= control target key start
LH: loop header
LB: loop body
LE: loop exit
PB: predicated region body
PF: predicated region fallthrough
CT: control target
= control target key end

     0   :  { %s626_s15 = smov 0   ;;  %s628_s16 = smov 0   ;;  %s668_s0 = inlined_call_operand.vmem [shape: bf16[4,72,128], index: 0, kind: input, shape index: {}]   ;;  %s669_s1 = inlined_call_operand.vmem [shape: bf16[4,8,72], index: 1, kind: input, shape index: {}]   ;;  %s670_s2 = inlined_call_operand.vmem [shape: f32[4,8,1], index: 2, kind: input, shape index: {}]   ;;  %s671_s3 = inlined_call_operand.vmem [shape: bf16[4,8,128], index: 3, kind: input, shape index: {}]   ;;  %s672_s4 = inlined_call_operand.vmem [shape: bf16[4,8,128], index: 4, kind: output, shape index: {}]  }
   0x1   :  { %s630_s17 = smov 0  }
   0x2 LB: > { %s26_s18 = sadd.s32 1, %s592_s16  ;;  %p506_p0 = scmp.ge.s32.totalorder %s596_s17, 1  ;;  %s596_s17 = sphi %s630_s17, %s14_s17   ;;  %s592_s16 = sphi %s628_s16, %s674_s16   ;;  %s588_s15 = sphi %s626_s15, %s673_s15  }
   0x3   : > { %p28_p1 = scmp.ge.s32.totalorder %s26_s18, 4  ;;  %p213_p2 = scmp.lt.s32.totalorder %s596_s17, 5 }
   0x5   : > { %s676_s18 = smov (%p28_p1, %s26_s18), 0  ;;  %p214_p3 = pnand %p506_p0, %p213_p2 }
   0x6   : > { %p259_p4 = scmp.lt.s32.totalorder (!%p214_p3), %s588_s15, 3 }
   0x7   : > { %217 = sbr.rel (%p214_p3) target bundleno = 237 (0xed), region = 36 }
   0xc   : > { %v598_v0 = vmov 0.0   ;;  %vm599_vm0 = vmmov 0   ;;  %s678_s15 = smov (!%p259_p4, %s588_s15), 3  ;;  %v600_v1 = vmov 0   ;;  %vm337_vm1 = vcmask 1043456  }
   0xd   : > { %526 = vmatprep.subr.bf16.mxu0 %v598_v0  ;;  %536 = vmatprep.mubr.msk.bf16.mxu0 %vm599_vm0, %v598_v0  ;;  %s540_s19 = smul.u32 36, %s678_s15  ;;  %s509_s20 = sshll.u32 %s678_s15, 3  ;;  %vm333_vm2 = vcmask 588800  }
   0xe   : > { %568 = vset.pattern.permute.xlu0 %v600_v1  ;;  %s274_s26 = scalar_lea.vmem %s670_s2, %s509_s20  ;;  %s508_s27 = sshll.u32 %s678_s15, 2 }
   0xf   : > { %s266_s23 = scalar_lea.vmem %s668_s0, %s540_s19  ;;  %v300_v5 = vld [vmem:[%s274_s26] sm:$0xff]  ;;  %s270_s30 = scalar_lea.vmem %s669_s1, %s508_s27 }
  0x10   : > { %v569_v2 = vld [vmem:[%s266_s23 + $0x20] ss:$0 sps:$4 sm:$0xff]   ;;  %v570_v4 = vld [vmem:[%s266_s23 + $0x18] sm:$0xff]   ;;  %303 = vperm.xlu0 %568, %v300_v5   ;;  %v571_v6 = vld [vmem:[%s266_s23 + $0x10] sm:$0xff]   ;;  %s281_s7 = scalar_lea.vmem %s671_s3, %s508_s27  ;;  %s288_s10 = scalar_lea.vmem %s672_s4, %s508_s27 }
  0x11   : > { %v339_v3 = vsel %vm337_vm1, %v569_v2, 0  ;;  %v572_v7 = vld [vmem:[%s266_s23 + $0x8] sm:$0xff]   ;;  %v573_v8 = vld [vmem:[%s266_s23] sm:$0xff]  }
  0x12   : > { %527 = vmatpush3.bf16.msra.mxu0 %v339_v3  ;;  %v290_v9 = vld [vmem:[%s270_s30] sm:$0xf] }
  0x13   : > { %528 = vmatprep.subr.bf16.mxu0 %v598_v0  ;;  %v381_v10 = vld [vmem:[%s281_s7] sm:$0xf] }
  0x14   : > { %v382_v12 = vunpack.c.l.bf16 %v381_v10 }
  0x16   : > { %529 = vmatpush3.bf16.msra.mxu0 %v570_v4 }
  0x17   : > { %530 = vmatprep.subr.bf16.mxu0 %v598_v0 }
  0x1a   : > { %531 = vmatpush3.bf16.msra.mxu0 %v571_v6 }
  0x1b   : > { %532 = vmatprep.subr.bf16.mxu0 %v598_v0 }
  0x1e   : > { %533 = vmatpush3.bf16.msra.mxu0 %v572_v7 }
  0x1f   : > { %534 = vmatprep.subr.bf16.mxu0 %v598_v0 }
  0x22   : > { %535 = vmatpush3.bf16.msra.mxu0 %v573_v8 }
  0x25   : > { %537 = vmatmul.mubr.msk.bf16.vlgmr.msra.gmra.mxu0 %vm333_vm2, %v290_v9 }
  0x8b   : > { %v304_v11 = vpop.permute.xlu0 %303 }
  0xe5   : > { %v375_v13 = vpop.f32.mrf.mxu0 }
  0xe6   : > { %v376_v14 = vadd.f32 %v375_v13, %v304_v11 }
  0xe7   : > { %v538_v15 = vpop.f32.mrf.mxu0 }
  0xe8   : > { %v383_v16 = vadd.f32 %v382_v12, %v376_v14 }
  0xe9   : > { %v378_v17 = vpop.f32.mrf.mxu0 }
  0xea   : > { %v384_v18 = vpack.c.bf16 %v383_v16, %v383_v16 }
  0xeb   : > { %v539_v19 = vpop.f32.mrf.mxu0 }
  0xec   : > { %385 = vst [vmem:[%s288_s10] sm:$0xf] %v384_v18 }
  0xed PF: > { %s14_s17 = sadd.s32 1, %s596_s17   ;;  %s673_s15 = smov %s592_s16 }
  0xee   : > { %p11_p5 = scmp.ge.s32.totalorder %s14_s17, 6   ;;  %s674_s16 = smov %s676_s18 }
  0xf0   :  { %13 = sbr.rel (!%p11_p5) target bundleno = 2 (0x2), region = 75 }

// kernel: feedback_block_heatmap_attention.18
= control target key start
LH: loop header
LB: loop body
LE: loop exit
PB: predicated region body
PF: predicated region fallthrough
CT: control target
= control target key end

     0   :  { %vm12_vm0 = vcmask 1043456   ;;  %v40_v18 = vlaneseq  ;;  %s109_s1 = inlined_call_operand.vmem [shape: f32[4,128], index: 1, kind: input, shape index: {}]   ;;  %s110_s0 = inlined_call_operand.vmem [shape: bf16[32,128], index: 0, kind: input, shape index: {}]   ;;  %s111_s2 = inlined_call_operand.vmem [shape: bf16[8,128], index: 2, kind: output, shape index: {}]  }
   0x1   :  { %v11_v0 = vld [vmem:[%s109_s1] sm:$0xf]  ;;  %v77_v21 = vld [vmem:[%s110_s0 + $0x8] sm:$0xff]  }
   0x2   :  { %v13_v1 = vsel %vm12_vm0, %v11_v0, -inf  ;;  %v41_v19 = vshrl.u32 %v40_v18, 7  ;;  %v70_v20 = vld [vmem:[%s110_s0] sm:$0xff]   ;;  %v75_v30 = vunpack.c.l.bf16 %v77_v21  ;;  %v76_v31 = vunpack.c.h.bf16 %v77_v21 }
   0x3   :  { %v14_v2 = vrot.slane %v13_v1, 4  ;;  %v71_v28 = vunpack.c.l.bf16 %v70_v20  ;;  %v72_v29 = vunpack.c.h.bf16 %v70_v20 }
   0x4   :  { %v42_v22 = vsub.s32 0, %v41_v19  ;;  %v47_v23 = vsub.s32 1, %v41_v19  ;;  %v53_v24 = vsub.s32 2, %v41_v19  ;;  %v59_v25 = vsub.s32 3, %v41_v19 }
   0x5   :  { %v15_v3 = vmax.f32 %v13_v1, %v14_v2 }
   0x7   :  { %v16_v4 = vrot.slane %v15_v3, 2 }
   0x9   :  { %v17_v5 = vmax.f32 %v15_v3, %v16_v4 }
   0xb   :  { %v18_v6 = vrot.slane %v17_v5, 1 }
   0xd   :  { %v19_v7 = vmax.f32 %v17_v5, %v18_v6 }
   0xf   :  { %v20_v8 = vsub.f32 %v11_v0, %v19_v7 }
  0x11   :  { %v21_v9 = vmul.f32 1.442695, %v20_v8 }
  0x13   :  { %78 = vpow2.f32 %v21_v9 }
  0x20   :  { %v79_v10 = vpop.eup %78 }
  0x21   :  { %v23_v11 = vsel %vm12_vm0, %v79_v10, 0.0 }
  0x22   :  { %v24_v12 = vrot.slane %v23_v11, 4 }
  0x24   :  { %v25_v13 = vadd.f32 %v24_v12, %v23_v11 }
  0x26   :  { %v26_v14 = vrot.slane %v25_v13, 2 }
  0x28   :  { %v27_v15 = vadd.f32 %v26_v14, %v25_v13 }
  0x2a   :  { %v28_v16 = vrot.slane %v27_v15, 1 }
  0x2c   :  { %v29_v17 = vadd.f32 %v28_v16, %v27_v15 }
  0x2e   :  { %80 = vrcp.f32 %v29_v17 }
  0x3b   :  { %v81_v26 = vpop.eup %80 }
  0x3c   :  { %v31_v27 = vmul.f32 %v81_v26, %v79_v10 }
  0x3e   :  { %v43_v32 = vrot.slane %v31_v27, %v42_v22  ;;  %v48_v33 = vrot.slane %v31_v27, %v47_v23  ;;  %v54_v34 = vrot.slane %v31_v27, %v53_v24  ;;  %v60_v35 = vrot.slane %v31_v27, %v59_v25 }
  0x40   :  { %v44_v36 = vmul.f32 %v71_v28, %v43_v32  ;;  %v49_v37 = vmul.f32 %v72_v29, %v48_v33  ;;  %v55_v38 = vmul.f32 %v75_v30, %v54_v34  ;;  %v61_v40 = vmul.f32 %v76_v31, %v60_v35 }
  0x42   :  { %v50_v39 = vadd.f32 %v49_v37, %v44_v36 }
  0x44   :  { %v56_v41 = vadd.f32 %v55_v38, %v50_v39 }
  0x46   :  { %v62_v42 = vadd.f32 %v61_v40, %v56_v41 }
  0x48   :  { %v63_v43 = vpack.c.bf16 %v62_v42, %v62_v42 }
  0x4a   :  { %64 = vst [vmem:[%s111_s2] sm:$0xf] %v63_v43 }

// kernel: tile.13
= control target key start
LH: loop header
LB: loop body
LE: loop exit
PB: predicated region body
PF: predicated region fallthrough
CT: control target
= control target key end

     0   :  { %s22_s0 = inlined_call_operand.vmem [shape: f32[8], index: 0, kind: input, shape index: {}]   ;;  %s23_s1 = inlined_call_operand.vmem [shape: f32[4,8], index: 1, kind: output, shape index: {}]  }
   0x1   :  { %v4_v0 = vld [vmem:[%s22_s0] ss:$0 sm:$0xff] }
   0x2   :  { %5 = vst [vmem:[%s23_s1] sm:$0xf] %v4_v0 }

// kernel: tile.0
= control target key start
LH: loop header
LB: loop body
LE: loop exit
PB: predicated region body
PF: predicated region fallthrough
CT: control target
= control target key end

     0   :  { %s67_s8 = smov 125   ;;  %vm8_vm0 = vcmask 7168   ;;  %s68_s11 = smov 126   ;;  %s118_s0 = inlined_call_operand.vmem [shape: f32[4,8], index: 0, kind: input, shape index: {}]   ;;  %s119_s1 = inlined_call_operand.vmem [shape: f32[1,32,1], index: 1, kind: output, shape index: {}]  }
   0x1   :  { %v5_v0 = vld [vmem:[%s118_s0] sm:$0xf]  ;;  %s66_s0 = smov 127   ;;  %s69_s12 = smov 124  }
   0x2   :  { %6 = vst [vmem:[#allocation0] sm:$0xf] %v5_v0  ;;  %s70_s13 = smov 123   ;;  %s71_s14 = smov 122  }
   0x3   :  { %s72_s15 = smov 121  }
   0x9   :  { %v10_v1 = vld [vmem:[#allocation0] sm:$0xf]  }
   0xa   :  { %v22_v2 = vld [vmem:[#allocation0] sm:$0xf]   ;;  %11 = vrot.lane.b32.xlu0 %v10_v1, %s66_s0 }
   0xb   :  { %23 = vrot.lane.b32.xlu1 %v22_v2, %s67_s8  ;;  %v16_v3 = vld [vmem:[#allocation0] sm:$0xf]  }
   0xc   :  { %v28_v4 = vld [vmem:[#allocation0] sm:$0xf]  }
   0xd   :  { %v7_v5 = vld [vmem:[#allocation0] sm:$0xf]  }
   0xe   :  { %9 = vst.msk [vmem:[%s119_s1] ss:$8 sm:$0xf] %vm8_vm0, %v7_v5   ;;  %17 = vrot.lane.b32.xlu0 %v16_v3, %s68_s11  ;;  %v34_v6 = vld [vmem:[#allocation0] sm:$0xf]  }
   0xf   :  { %29 = vrot.lane.b32.xlu1 %v28_v4, %s69_s12  ;;  %v40_v7 = vld [vmem:[#allocation0] sm:$0xf]  }
  0x10   :  { %v46_v8 = vld [vmem:[#allocation0] sm:$0xf]  }
  0x12   :  { %35 = vrot.lane.b32.xlu0 %v34_v6, %s70_s13 }
  0x13   :  { %41 = vrot.lane.b32.xlu1 %v40_v7, %s71_s14 }
  0x16   :  { %47 = vrot.lane.b32.xlu0 %v46_v8, %s72_s15 }
  0x7c   :  { %v12_v9 = vpop.permute.xlu0 %11  }
  0x7d   :  { %v24_v10 = vpop.permute.xlu1 %23   ;;  %52 = vst.msk [vmem:[%s119_s1 + $0x1] ss:$8 sm:$0xf] %vm8_vm0, %v12_v9  }
  0x7e   :  { %54 = vst.msk [vmem:[%s119_s1 + $0x3] ss:$8 sm:$0xf] %vm8_vm0, %v24_v10  }
  0x80   :  { %v18_v11 = vpop.permute.xlu0 %17  }
  0x81   :  { %v30_v12 = vpop.permute.xlu1 %29   ;;  %53 = vst.msk [vmem:[%s119_s1 + $0x2] ss:$8 sm:$0xf] %vm8_vm0, %v18_v11  }
  0x82   :  { %55 = vst.msk [vmem:[%s119_s1 + $0x4] ss:$8 sm:$0xf] %vm8_vm0, %v30_v12  }
  0x84   :  { %v36_v13 = vpop.permute.xlu0 %35  }
  0x85   :  { %v42_v14 = vpop.permute.xlu1 %41   ;;  %56 = vst.msk [vmem:[%s119_s1 + $0x5] ss:$8 sm:$0xf] %vm8_vm0, %v36_v13  }
  0x86   :  { %57 = vst.msk [vmem:[%s119_s1 + $0x6] ss:$8 sm:$0xf] %vm8_vm0, %v42_v14  }
  0x88   :  { %v48_v15 = vpop.permute.xlu0 %47  }
  0x89   :  { %58 = vst.msk [vmem:[%s119_s1 + $0x7] ss:$8 sm:$0xf] %vm8_vm0, %v48_v15  }

// kernel: feedback_block_heatmap_attention.19
= control target key start
LH: loop header
LB: loop body
LE: loop exit
PB: predicated region body
PF: predicated region fallthrough
CT: control target
= control target key end

     0   :  { %vm96_vm0 = vcmask 1043456   ;;  %v245_v1 = vmov 0   ;;  %vm89_vm1 = vcmask 588800   ;;  %s307_s0 = inlined_call_operand.vmem [shape: bf16[1,72,128], index: 0, kind: input, shape index: {}]   ;;  %s308_s1 = inlined_call_operand.vmem [shape: bf16[1,32,72], index: 1, kind: input, shape index: {}]   ;;  %s309_s2 = inlined_call_operand.vmem [shape: f32[1,32,1], index: 2, kind: input, shape index: {}]   ;;  %s310_s3 = inlined_call_operand.vmem [shape: bf16[1,32,128], index: 3, kind: output, shape index: {}]  }
   0x1   :  { %v238_v0 = vld [vmem:[%s307_s0 + $0x20] ss:$0 sps:$4 sm:$0xff]   ;;  %237 = vset.pattern.permute.xlu1 %v245_v1  ;;  %236 = vset.pattern.permute.xlu0 %v245_v1  ;;  %v239_v2 = vld [vmem:[%s307_s0 + $0x18] sm:$0xff]   ;;  %v240_v4 = vld [vmem:[%s307_s0 + $0x10] sm:$0xff]  }
   0x2   :  { %234 = vmatprep.subr.msk.bf16.mxu0 %vm96_vm0, %v238_v0  ;;  %v98_v3 = vsel %vm96_vm0, %v238_v0, 0  ;;  %v243_v5 = vld [vmem:[%s308_s1] sm:$0xff]   ;;  %v30_v6 = vld [vmem:[%s309_s2 + $0x10] sm:$0xff]  ;;  %v241_v8 = vld [vmem:[%s307_s0 + $0x8] sm:$0xff]  }
   0x3   :  { %221 = vmatpush3.bf16.msra.mxu0 %v98_v3  ;;  %230 = vmatprep.mubr.msk.bf16.mxu0 %vm89_vm1, %v243_v5  ;;  %v28_v7 = vld [vmem:[%s309_s2] sm:$0xff]  ;;  %v31_v9 = vld [vmem:[%s309_s2 + $0x18] sm:$0xff]  ;;  %v29_v10 = vld [vmem:[%s309_s2 + $0x8] sm:$0xff] }
   0x4   :  { %222 = vmatprep.subr.bf16.mxu0 %v239_v2  ;;  %44 = vperm.xlu1 %237, %v30_v6   ;;  %v242_v11 = vld [vmem:[%s307_s0] sm:$0xff]   ;;  %v244_v12 = vld [vmem:[%s308_s1 + $0x8] sm:$0xff]  }
   0x5   :  { %34 = vperm.xlu0 %236, %v28_v7  }
   0x7   :  { %223 = vmatpush3.bf16.msra.mxu0 %v239_v2 }
   0x8   :  { %224 = vmatprep.subr.bf16.mxu0 %v240_v4  ;;  %49 = vperm.xlu1 %237, %v31_v9  }
   0x9   :  { %39 = vperm.xlu0 %236, %v29_v10  }
   0xb   :  { %225 = vmatpush3.bf16.msra.mxu0 %v240_v4 }
   0xc   :  { %226 = vmatprep.subr.bf16.mxu0 %v241_v8 }
   0xf   :  { %227 = vmatpush3.bf16.msra.mxu0 %v241_v8 }
  0x10   :  { %228 = vmatprep.subr.bf16.mxu0 %v242_v11 }
  0x13   :  { %229 = vmatpush3.bf16.msra.mxu0 %v242_v11 }
  0x16   :  { %231 = vmatmul.mubr.msk.bf16.vlgmr.msra.gmra.mxu0 %vm89_vm1, %v244_v12 }
  0x7f   :  { %v45_v13 = vpop.permute.xlu1 %44 }
  0x80   :  { %v35_v14 = vpop.permute.xlu0 %34 }
  0x83   :  { %v50_v19 = vpop.permute.xlu1 %49 }
  0x84   :  { %v40_v23 = vpop.permute.xlu0 %39 }
  0xd6   :  { %v232_v15 = vpop.f32.mrf.mxu0 }
  0xd7   :  { %v143_v16 = vadd.f32 %v232_v15, %v45_v13 }
  0xd8   :  { %v134_v17 = vpop.f32.mrf.mxu0 }
  0xd9   :  { %v135_v18 = vadd.f32 %v134_v17, %v35_v14  ;;  %v155_v21 = vmul.f32 0.2, %v143_v16  ;;  %vm151_vm2 = vcmp.ge.f32.partialorder %v143_v16, 0.0 }
  0xda   :  { %v233_v20 = vpop.f32.mrf.mxu0 }
  0xdb   :  { %v146_v22 = vadd.f32 %v233_v20, %v50_v19  ;;  %v153_v25 = vmul.f32 0.2, %v135_v18  ;;  %vm149_vm4 = vcmp.ge.f32.partialorder %v135_v18, 0.0  ;;  %v159_v28 = vsel %vm151_vm2, %v143_v16, %v155_v21 }
  0xdc   :  { %v137_v24 = vpop.f32.mrf.mxu0 }
  0xdd   :  { %vm152_vm3 = vcmp.ge.f32.partialorder %v146_v22, 0.0  ;;  %v156_v26 = vmul.f32 0.2, %v146_v22  ;;  %v138_v27 = vadd.f32 %v137_v24, %v40_v23  ;;  %v157_v32 = vsel %vm149_vm4, %v135_v18, %v153_v25 }
  0xdf   :  { %v160_v29 = vsel %vm152_vm3, %v146_v22, %v156_v26  ;;  %vm150_vm5 = vcmp.ge.f32.partialorder %v138_v27, 0.0  ;;  %v154_v30 = vmul.f32 0.2, %v138_v27 }
  0xe0   :  { %v210_v31 = vpack.c.bf16 %v160_v29, %v159_v28 }
  0xe1   :  { %v158_v33 = vsel %vm150_vm5, %v138_v27, %v154_v30 }
  0xe2   :  { %212 = vst [vmem:[%s310_s3 + $0x8] sm:$0xff] %v210_v31   ;;  %v205_v34 = vpack.c.bf16 %v158_v33, %v157_v32 }
  0xe4   :  { %206 = vst [vmem:[%s310_s3] sm:$0xff] %v205_v34  }

// kernel: feedback_block_heatmap_attention.20
= control target key start
LH: loop header
LB: loop body
LE: loop exit
PB: predicated region body
PF: predicated region fallthrough
CT: control target
= control target key end

     0   :  { %v350_v1 = vmov 0.0   ;;  %vm351_vm0 = vmmov 0   ;;  %v352_v3 = vmov 0   ;;  %vm177_vm1 = vcmask 261120   ;;  %s439_s0 = inlined_call_operand.vmem [shape: bf16[1,288,128], index: 0, kind: input, shape index: {}]   ;;  %s440_s1 = inlined_call_operand.vmem [shape: bf16[1,8,288], index: 1, kind: input, shape index: {}]   ;;  %s441_s2 = inlined_call_operand.vmem [shape: f32[1,8,1], index: 2, kind: input, shape index: {}]   ;;  %s442_s3 = inlined_call_operand.vmem [shape: bf16[1,8,128], index: 3, kind: output, shape index: {}]  }
   0x1   :  { %v329_v0 = vld [vmem:[%s439_s0 + $0x78] sm:$0xff]   ;;  %317 = vmatprep.subr.bf16.mxu1 %v350_v1  ;;  %321 = vmatprep.mubr.msk.bf16.mxu1 %vm351_vm0, %v350_v1  ;;  %v331_v4 = vld [vmem:[%s439_s0 + $0x70] sm:$0xff]   ;;  %v333_v6 = vld [vmem:[%s439_s0 + $0x68] sm:$0xff]  }
   0x2   :  { %v330_v2 = vld [vmem:[%s439_s0 + $0x38] sm:$0xff]   ;;  %328 = vset.pattern.permute.xlu0 %v352_v3  ;;  %292 = vmatprep.subr.bf16.mxu0 %v329_v0  ;;  %v332_v5 = vld [vmem:[%s439_s0 + $0x30] sm:$0xff]   ;;  %v334_v7 = vld [vmem:[%s439_s0 + $0x28] sm:$0xff]  }
   0x3   :  { %293 = vmatpush3.bf16.msra.mxu0 %v330_v2  ;;  %v335_v8 = vld [vmem:[%s439_s0 + $0x60] sm:$0xff]   ;;  %v337_v10 = vld [vmem:[%s439_s0 + $0x58] sm:$0xff]   ;;  %v343_v11 = vld [vmem:[%s439_s0 + $0x88] sm:$0xff]  }
   0x4   :  { %294 = vmatprep.subr.bf16.mxu0 %v331_v4  ;;  %v336_v9 = vld [vmem:[%s439_s0 + $0x20] sm:$0xff]   ;;  %v338_v12 = vld [vmem:[%s439_s0 + $0x18] sm:$0xff]   ;;  %v339_v13 = vld [vmem:[%s439_s0 + $0x50] sm:$0xff]   ;;  %318 = vmatpush3.bf16.msra.mxu1 %v343_v11 }
   0x5   :  { %319 = vmatprep.subr.bf16.mxu1 %v350_v1  ;;  %v346_v14 = vld [vmem:[%s439_s0 + $0x80] sm:$0xff]   ;;  %v340_v16 = vld [vmem:[%s439_s0 + $0x10] sm:$0xff]   ;;  %v349_v18 = vld [vmem:[%s440_s1 + $0x8] ss:$0 sps:$4 sm:$0xff]  }
   0x6   :  { %v15_v15 = vld [vmem:[%s440_s1] sm:$0xff]  ;;  %v341_v20 = vld [vmem:[%s439_s0 + $0x48] sm:$0xff]  }
   0x7   :  { %295 = vmatpush3.bf16.msra.mxu0 %v332_v5  ;;  %v271_v17 = vcombine.high %v15_v15, %v15_v15  ;;  %v53_v19 = vld [vmem:[%s441_s2] sm:$0xff]  ;;  %v342_v21 = vld [vmem:[%s439_s0 + $0x8] sm:$0xff]   ;;  %v270_v24 = vcombine.low %v15_v15, %v15_v15 }
   0x8   :  { %296 = vmatprep.subr.bf16.mxu0 %v333_v6  ;;  %320 = vmatpush3.bf16.msra.mxu1 %v346_v14  ;;  %v344_v22 = vld [vmem:[%s439_s0 + $0x40] sm:$0xff]  }
   0x9   :  { %213 = vmatprep.mubr.bf16.mxu0 %v271_v17  ;;  %56 = vperm.xlu0 %328, %v53_v19   ;;  %v345_v23 = vld [vmem:[%s439_s0] sm:$0xff]  }
   0xb   :  { %297 = vmatpush3.bf16.msra.mxu0 %v334_v7  ;;  %322 = vmatmul.mubr.msk.bf16.vlgmr.msra.gmra.mxu1 %vm177_vm1, %v349_v18 }
   0xc   :  { %298 = vmatprep.subr.bf16.mxu0 %v335_v8 }
   0xf   :  { %299 = vmatpush3.bf16.msra.mxu0 %v336_v9 }
  0x10   :  { %300 = vmatprep.subr.bf16.mxu0 %v337_v10 }
  0x13   :  { %301 = vmatpush3.bf16.msra.mxu0 %v338_v12 }
  0x14   :  { %302 = vmatprep.subr.bf16.mxu0 %v339_v13 }
  0x17   :  { %303 = vmatpush3.bf16.msra.mxu0 %v340_v16 }
  0x18   :  { %304 = vmatprep.subr.bf16.mxu0 %v341_v20 }
  0x1b   :  { %305 = vmatpush3.bf16.msra.mxu0 %v342_v21 }
  0x1c   :  { %306 = vmatprep.subr.bf16.mxu0 %v344_v22 }
  0x1f   :  { %307 = vmatpush3.bf16.msra.mxu0 %v345_v23 }
  0x22   :  { %214 = vmatmul.mubr.bf16.vlgmr.msra.gmra.mxu0 %v270_v24 }
  0x84   :  { %v57_v31 = vpop.permute.xlu0 %56 }
  0xcb   :  { %v255_v25 = vpop.f32.mrf.mxu1 }
  0xcd   :  { %v323_v26 = vpop.f32.mrf.mxu1 }
  0xcf   :  { %v258_v27 = vpop.f32.mrf.mxu1 }
  0xd1   :  { %v324_v28 = vpop.f32.mrf.mxu1 }
  0xe2   :  { %v308_v29 = vpop.f32.mrf.mxu0 }
  0xe4   :  { %v309_v30 = vpop.f32.mrf.mxu0 }
  0xe5   :  { %v310_v32 = vadd.f32 %v309_v30, %v308_v29 }
  0xe6   :  { %v311_v33 = vpop.f32.mrf.mxu0 }
  0xe7   :  { %v216_v34 = vadd.f32 %v310_v32, %v57_v31 }
  0xe8   :  { %v312_v35 = vpop.f32.mrf.mxu0 }
  0xe9   :  { %v256_v36 = vadd.f32 %v255_v25, %v216_v34 }
  0xeb   :  { %vm261_vm2 = vcmp.ge.f32.partialorder %v256_v36, 0.0  ;;  %v262_v37 = vmul.f32 0.2, %v256_v36 }
  0xed   :  { %v263_v38 = vsel %vm261_vm2, %v256_v36, %v262_v37 }
  0xee   :  { %v264_v39 = vpack.c.bf16 %v263_v38, %v263_v38 }
  0xf0   :  { %265 = vst [vmem:[%s442_s3] sm:$0xf] %v264_v39 }

// kernel: feedback_block_heatmap_attention.21
= control target key start
LH: loop header
LB: loop body
LE: loop exit
PB: predicated region body
PF: predicated region fallthrough
CT: control target
= control target key end

     0   :  { %v98_v0 = vmov 0.0   ;;  %vm99_vm0 = vmmov 0   ;;  %v100_v2 = vmov 0   ;;  %vm30_vm1 = vcmask 130048   ;;  %s133_s0 = inlined_call_operand.vmem [shape: bf16[1,16,128], index: 0, kind: input, shape index: {}]   ;;  %s134_s1 = inlined_call_operand.vmem [shape: bf16[1,8,16], index: 1, kind: input, shape index: {}]   ;;  %s135_s2 = inlined_call_operand.vmem [shape: f32[1,8,1], index: 2, kind: input, shape index: {}]   ;;  %s136_s3 = inlined_call_operand.vmem [shape: bf16[1,8,128], index: 3, kind: output, shape index: {}]  }
   0x1   :  { %87 = vmatprep.subr.bf16.mxu0 %v98_v0  ;;  %v97_v1 = vld [vmem:[%s133_s0] sm:$0xff]   ;;  %89 = vmatprep.mubr.msk.bf16.mxu0 %vm99_vm0, %v98_v0 }
   0x2   :  { %96 = vset.pattern.permute.xlu0 %v100_v2  ;;  %v18_v3 = vld [vmem:[%s135_s2] sm:$0xff]  ;;  %88 = vmatpush3.bf16.msra.mxu0 %v97_v1 }
   0x3   :  { %v15_v4 = vld [vmem:[%s134_s1] sm:$0xf]  ;;  %21 = vperm.xlu0 %96, %v18_v3  }
   0x5   :  { %90 = vmatmul.mubr.msk.bf16.vlgmr.msra.gmra.mxu0 %vm30_vm1, %v15_v4 }
  0x7e   :  { %v22_v5 = vpop.permute.xlu0 %21 }
  0xc5   :  { %v68_v6 = vpop.f32.mrf.mxu0 }
  0xc6   :  { %v69_v7 = vadd.f32 %v68_v6, %v22_v5 }
  0xc7   :  { %v91_v8 = vpop.f32.mrf.mxu0 }
  0xc8   :  { %vm74_vm2 = vcmp.ge.f32.partialorder %v69_v7, 0.0  ;;  %v75_v9 = vmul.f32 0.2, %v69_v7 }
  0xc9   :  { %v71_v10 = vpop.f32.mrf.mxu0 }
  0xca   :  { %v76_v11 = vsel %vm74_vm2, %v69_v7, %v75_v9 }
  0xcb   :  { %v77_v12 = vpack.c.bf16 %v76_v11, %v76_v11  ;;  %v92_v13 = vpop.f32.mrf.mxu0 }
  0xcd   :  { %78 = vst [vmem:[%s136_s3] sm:$0xf] %v77_v12 }

// kernel: feedback_block_heatmap_attention.23
= control target key start
LH: loop header
LB: loop body
LE: loop exit
PB: predicated region body
PF: predicated region fallthrough
CT: control target
= control target key end

     0   :  { %v184_v1 = vmov 0   ;;  %vm46_vm0 = vcmask 130048   ;;  %s229_s0 = inlined_call_operand.vmem [shape: bf16[1,16,512], index: 0, kind: input, shape index: {}]   ;;  %s230_s2 = inlined_call_operand.vmem [shape: f32[1,8,1], index: 2, kind: input, shape index: {}]   ;;  %s231_s1 = inlined_call_operand.vmem [shape: bf16[1,8,16], index: 1, kind: input, shape index: {}]   ;;  %s232_s3 = inlined_call_operand.vmem [shape: bf16[1,8,512], index: 3, kind: output, shape index: {}]  }
   0x1   :  { %v178_v0 = vld [vmem:[%s229_s0 + $0x4] ss:$16 sps:$4 sm:$0xff]   ;;  %82 = vmatprep.mubr.bf16.mxu0 %v184_v1  ;;  %123 = vmatprep.mubr.bf16.mxu1 %v184_v1  ;;  %v180_v2 = vld [vmem:[%s229_s0 + $0xc] ss:$16 sps:$4 sm:$0xff]   ;;  %v182_v3 = vld [vmem:[%s229_s0] ss:$16 sps:$4 sm:$0xff]  }
   0x2   :  { %177 = vset.pattern.permute.xlu0 %v184_v1  ;;  %64 = vmatprep.subr.bf16.mxu0 %v178_v0  ;;  %v183_v4 = vld [vmem:[%s229_s0 + $0x8] ss:$16 sps:$4 sm:$0xff]   ;;  %v20_v5 = vld [vmem:[%s230_s2] sm:$0xff] }
   0x3   :  { %105 = vmatprep.subr.bf16.mxu1 %v180_v2  ;;  %65 = vmatpush1.bf16.msra.mxu0 %v182_v3  ;;  %v15_v6 = vld [vmem:[%s231_s1] sm:$0xf] }
   0x4   :  { %106 = vmatpush1.bf16.msra.mxu1 %v183_v4  ;;  %23 = vperm.xlu0 %177, %v20_v5  }
   0x6   :  { %170 = vmatmul.mubr.msk.bf16.vlgmr.msra.gmra.mxu0 %vm46_vm0, %v15_v6 }
   0x7   :  { %171 = vmatmul.mubr.msk.bf16.vlgmr.msra.gmra.mxu1 %vm46_vm0, %v15_v6 }
  0x7f   :  { %v24_v7 = vpop.permute.xlu0 %23 }
  0xc6   :  { %v84_v8 = vpop.f32.mrf.mxu0 }
  0xc7   :  { %v125_v9 = vpop.f32.mrf.mxu1  ;;  %v85_v10 = vadd.f32 %v84_v8, %v24_v7 }
  0xc8   :  { %v126_v11 = vadd.f32 %v125_v9, %v24_v7  ;;  %v86_v12 = vpop.f32.mrf.mxu0 }
  0xc9   :  { %v127_v13 = vpop.f32.mrf.mxu1  ;;  %v136_v14 = vmul.f32 0.2, %v85_v10  ;;  %v87_v16 = vadd.f32 %v86_v12, %v24_v7  ;;  %vm132_vm1 = vcmp.ge.f32.partialorder %v85_v10, 0.0 }
  0xca   :  { %v138_v15 = vmul.f32 0.2, %v126_v11  ;;  %v128_v17 = vadd.f32 %v127_v13, %v24_v7  ;;  %v88_v18 = vpop.f32.mrf.mxu0  ;;  %vm134_vm2 = vcmp.ge.f32.partialorder %v126_v11, 0.0 }
  0xcb   :  { %v129_v19 = vpop.f32.mrf.mxu1  ;;  %vm133_vm3 = vcmp.ge.f32.partialorder %v87_v16, 0.0  ;;  %v137_v20 = vmul.f32 0.2, %v87_v16  ;;  %v140_v24 = vsel %vm132_vm1, %v85_v10, %v136_v14 }
  0xcc   :  { %vm135_vm4 = vcmp.ge.f32.partialorder %v128_v17, 0.0  ;;  %v139_v21 = vmul.f32 0.2, %v128_v17  ;;  %v89_v22 = vpop.f32.mrf.mxu0  ;;  %v142_v25 = vsel %vm134_vm2, %v126_v11, %v138_v15 }
  0xcd   :  { %v130_v23 = vpop.f32.mrf.mxu1  ;;  %v141_v26 = vsel %vm133_vm3, %v87_v16, %v137_v20 }
  0xce   :  { %v143_v27 = vsel %vm135_vm4, %v128_v17, %v139_v21  ;;  %v174_v28 = vpack.c.bf16 %v141_v26, %v140_v24 }
  0xcf   :  { %v175_v29 = vpack.c.bf16 %v143_v27, %v142_v25 }
  0xd0   :  { %160 = vst [vmem:[%s232_s3] sm:$0xff] %v174_v28 }
  0xd1   :  { %161 = vst [vmem:[%s232_s3 + $0x8] sm:$0xff] %v175_v29 }

// kernel: feedback_block_heatmap_attention.25
= control target key start
LH: loop header
LB: loop body
LE: loop exit
PB: predicated region body
PF: predicated region fallthrough
CT: control target
= control target key end

     0   :  { %v97_v0 = vmov 0.0   ;;  %vm98_vm0 = vmmov 0   ;;  %v99_v2 = vmov 0   ;;  %vm30_vm1 = vcmask 130048   ;;  %s132_s0 = inlined_call_operand.vmem [shape: bf16[1,16,128], index: 0, kind: input, shape index: {}]   ;;  %s133_s1 = inlined_call_operand.vmem [shape: bf16[1,8,16], index: 1, kind: input, shape index: {}]   ;;  %s134_s2 = inlined_call_operand.vmem [shape: f32[1,8,1], index: 2, kind: input, shape index: {}]   ;;  %s135_s3 = inlined_call_operand.vmem [shape: f32[1,8,128], index: 3, kind: output, shape index: {}]  }
   0x1   :  { %86 = vmatprep.subr.bf16.mxu0 %v97_v0  ;;  %v96_v1 = vld [vmem:[%s132_s0] sm:$0xff]   ;;  %88 = vmatprep.mubr.msk.bf16.mxu0 %vm98_vm0, %v97_v0 }
   0x2   :  { %95 = vset.pattern.permute.xlu0 %v99_v2  ;;  %v18_v3 = vld [vmem:[%s134_s2] sm:$0xff]  ;;  %87 = vmatpush3.bf16.msra.mxu0 %v96_v1 }
   0x3   :  { %v15_v4 = vld [vmem:[%s133_s1] sm:$0xf]  ;;  %21 = vperm.xlu0 %95, %v18_v3  }
   0x5   :  { %89 = vmatmul.mubr.msk.bf16.vlgmr.msra.gmra.mxu0 %vm30_vm1, %v15_v4 }
  0x7e   :  { %v22_v5 = vpop.permute.xlu0 %21 }
  0xc5   :  { %v68_v6 = vpop.f32.mrf.mxu0 }
  0xc6   :  { %v69_v7 = vadd.f32 %v68_v6, %v22_v5 }
  0xc7   :  { %v90_v8 = vpop.f32.mrf.mxu0 }
  0xc8   :  { %vm74_vm2 = vcmp.ge.f32.partialorder %v69_v7, 0.0  ;;  %v75_v9 = vmul.f32 0.2, %v69_v7 }
  0xc9   :  { %v71_v10 = vpop.f32.mrf.mxu0 }
  0xca   :  { %v76_v11 = vsel %vm74_vm2, %v69_v7, %v75_v9 }
  0xcb   :  { %77 = vst [vmem:[%s135_s3] sm:$0xff] %v76_v11  ;;  %v91_v12 = vpop.f32.mrf.mxu0 }

</bundles_post_ra>
